<compile_context>
chip_gen: v5e
topology: v5e:2x2
jax: 0.10.0
libtpu: 0.0.40
codegen_flags: <defaults>
</compile_context>

<pallas_src>
import jax
import jax.numpy as jnp
import numpy as np
from jax import lax
from jax.experimental import pallas as pl
from jax.experimental.pallas import tpu as pltpu


def _smooth_l1(x):
    # PyTorch F.smooth_l1_loss elementwise term, beta = 1.0
    ax = jnp.abs(x)
    return jnp.where(ax < 1.0, 0.5 * x * x, ax - 0.5)


def _vmem_limit_bytes():
    # ~25% headroom on whatever the device actually has; static fallback of
    # 48 MiB is safe on v7x (64 MiB physical) and above the default scoped
    # limit on v5e/v6e (16 / 32 MiB).
    try:
        cap = getattr(pltpu.get_tpu_info(), "vmem_capacity_bytes", None)
        if cap:
            return int(cap * 3 // 4)
    except Exception:
        pass
    return 48 * 1024 * 1024


def _pick_tk(d):
    # Tile the feature (contraction) axis only when it is large and
    # 128-aligned; otherwise use a single full-width block (Mosaic pads the
    # lane dim in VMEM for free, no wrapper-side jnp.pad round trip).
    # TODO(synk): very large feature dims that are not multiples of 128 stay
    # single-block; remainder masking for partial K blocks is not implemented.
    max_tk = 512
    if d <= max_tk or d % 128 != 0:
        return d
    tk = max_tk
    while d % tk != 0:
        tk -= 128
    return tk


def _make_rkd_kernel(n, dist_ratio, angle_ratio, normalize):
    inv_n3 = 1.0 / float(n ** 3)
    inv_n2 = 1.0 / float(n * n)
    inv_offdiag = 1.0 / float(n * (n - 1))

    def rkd_kernel(t_ref, s_ref, out_ref, pt_ref, ps_ref, dct_ref, dcs_ref):
        k_idx = pl.program_id(0)
        nk = pl.num_programs(0)

        @pl.when(k_idx == 0)
        def _():
            pt_ref[...] = jnp.zeros_like(pt_ref)
            ps_ref[...] = jnp.zeros_like(ps_ref)

        # Gram accumulation over the K-axis grid: P += X_k @ X_k^T.
        # Contraction is on the lane dim of both operands (native
        # transposed-RHS MXU path); accumulation in f32.
        dn = (((1,), (1,)), ((), ()))
        pt_ref[...] += lax.dot_general(t_ref[...], t_ref[...], dn,
                                       preferred_element_type=jnp.float32)
        ps_ref[...] += lax.dot_general(s_ref[...], s_ref[...], dn,
                                       preferred_element_type=jnp.float32)

        # ------------------- loss epilogue (last K step) -------------------
        @pl.when(k_idx == nk - 1)
        def _():
            p_t = pt_ref[...]
            p_s = ps_ref[...]

            row_ids = lax.broadcasted_iota(jnp.int32, (n, n), 0)
            col_ids = lax.broadcasted_iota(jnp.int32, (n, n), 1)
            eye = row_ids == col_ids

            def diag_of(p):
                dm = jnp.where(eye, p, 0.0)
                return (jnp.sum(dm, axis=0, keepdims=True),   # [1,N]
                        jnp.sum(dm, axis=1, keepdims=True))   # [N,1]

            dt_r, dt_c = diag_of(p_t)
            ds_r, ds_c = diag_of(p_s)
            # Stash diagonals so the anchor loop can read P[i,i] with a cheap
            # dynamic sublane slice instead of a masked reduction.
            dct_ref[...] = dt_c
            dcs_ref[...] = ds_c

            # ---------------- RKD distance loss -----------------------------
            def pdist(p, d_r, d_c):
                res = jnp.sqrt(jnp.maximum(d_r + d_c - 2.0 * p, 1e-10))
                return jnp.where(eye, 0.0, res)

            def norm_by_pos_mean(m):
                # Off-diagonal entries are >= sqrt(1e-10) > 0 and the diagonal
                # is exactly zero, so the positive count is statically n*(n-1).
                mean = jnp.sum(m) * inv_offdiag
                return m / (mean + 1e-07)

            d_t = norm_by_pos_mean(pdist(p_t, dt_r, dt_c))
            d_s = norm_by_pos_mean(pdist(p_s, ds_r, ds_c))
            dist_loss = jnp.sum(_smooth_l1(d_s - d_t)) * inv_n2

            # ---------------- RKD angle loss ---------------------------------
            onehot_iota = lax.broadcasted_iota(jnp.int32, (n, 1), 0)

            def gram_slab(i, p, p_ref_, dcol, dcol_ref_, d_row, onehot, keep):
                # G[i][j,k] = P[j,k] - P[j,i] - P[i,k] + P[i,i]
                row_i = p_ref_[pl.ds(i, 1), :]          # [1,N] sublane slice
                pii = dcol_ref_[pl.ds(i, 1), :]         # [1,1]
                # Column i of P via a tiny one-hot MXU matvec (P symmetric):
                # keeps the anchor loop off the XLU.
                col_i = lax.dot_general(p, onehot, (((1,), (0,)), ((), ())),
                                        preferred_element_type=jnp.float32)  # [N,1]
                g = p - col_i - row_i + pii
                if normalize:
                    # 1/max(||x_. - x_i||, 1e-12) == rsqrt(max(nsq, 1e-24))
                    inv_r = lax.rsqrt(jnp.maximum(d_row + pii - 2.0 * row_i, 1e-24))
                    inv_c = lax.rsqrt(jnp.maximum(dcol + pii - 2.0 * col_i, 1e-24))
                    g = g * inv_c * inv_r
                # Row i / column i of the Gram are exactly zero in the
                # reference (zero difference vector) — enforce exactly.
                return jnp.where(keep, g, 0.0)

            def angle_body(i, acc):
                onehot = (onehot_iota == i).astype(jnp.float32)      # [N,1]
                keep = (row_ids != i) & (col_ids != i)
                g_t = gram_slab(i, p_t, pt_ref, dt_c, dct_ref, dt_r, onehot, keep)
                g_s = gram_slab(i, p_s, ps_ref, ds_c, dcs_ref, ds_r, onehot, keep)
                # Elementwise accumulation; single reduction after the loop.
                return acc + _smooth_l1(g_s - g_t)

            angle_acc = lax.fori_loop(0, n, angle_body,
                                      jnp.zeros((n, n), jnp.float32),
                                      unroll=min(8, n))
            angle_loss = jnp.sum(angle_acc) * inv_n3

            out_ref[0, 0] = (angle_ratio * angle_loss
                             + dist_ratio * dist_loss).astype(jnp.float32)

    return rkd_kernel


def rkd_loss(teacher, student, dist_ratio=0.5, angle_ratio=0.5, normalize=True):
    n, d = teacher.shape
    assert student.shape == (n, d)
    assert n >= 2, "RKD losses need at least 2 embeddings"

    tk = _pick_tk(d)
    nk = d // tk
    kernel = _make_rkd_kernel(n, float(dist_ratio), float(angle_ratio),
                              bool(normalize))

    cost = pl.CostEstimate(
        flops=int(4 * n * n * d + 8 * n ** 3 + 32 * n * n),
        transcendentals=int((4 if normalize else 0) * n * n + 2 * n * n),
        bytes_accessed=int(2 * n * d * teacher.dtype.itemsize + 4),
    )

    out = pl.pallas_call(
        kernel,
        out_shape=jax.ShapeDtypeStruct((1, 1), jnp.float32),
        grid=(nk,),
        in_specs=[
            pl.BlockSpec((n, tk), lambda k: (0, k)),
            pl.BlockSpec((n, tk), lambda k: (0, k)),
        ],
        out_specs=pl.BlockSpec(memory_space=pltpu.MemorySpace.SMEM),
        scratch_shapes=[
            pltpu.VMEM((n, n), jnp.float32),   # teacher Gram accumulator
            pltpu.VMEM((n, n), jnp.float32),   # student Gram accumulator
            pltpu.VMEM((n, 1), jnp.float32),   # teacher diag (column form)
            pltpu.VMEM((n, 1), jnp.float32),   # student diag (column form)
        ],
        compiler_params=pltpu.CompilerParams(
            dimension_semantics=("arbitrary",),
            vmem_limit_bytes=_vmem_limit_bytes(),
        ),
        cost_estimate=cost,
    )(teacher, student)
    return out[0, 0]


def rkd_loss_reference(teacher, student, dist_ratio=0.5, angle_ratio=0.5,
                       normalize=True):
    """Pure-JAX reference mirroring the PyTorch module, for validation."""
    teacher = teacher.astype(jnp.float32)
    student = student.astype(jnp.float32)
    n = teacher.shape[0]
    hp = jax.lax.Precision.HIGHEST

    def angle_gram(x):
        diff = x[None, :, :] - x[:, None, :]
        if normalize:
            nrm = jnp.maximum(jnp.linalg.norm(diff, axis=2, keepdims=True), 1e-12)
            diff = diff / nrm
        return jnp.einsum("ijd,ikd->ijk", diff, diff, precision=hp)

    angle = jnp.mean(_smooth_l1(angle_gram(student) - angle_gram(teacher)))

    def pdist(x):
        sq = jnp.sum(x * x, axis=1)
        res = sq[None, :] + sq[:, None] - 2.0 * jnp.matmul(x, x.T, precision=hp)
        res = jnp.sqrt(jnp.clip(res, 1e-10))
        return res * (1.0 - jnp.eye(n, dtype=x.dtype))

    def nrm(m):
        pos = m > 0
        mean = jnp.sum(jnp.where(pos, m, 0.0)) / jnp.sum(pos)
        return m / (mean + 1e-07)

    dist = jnp.mean(_smooth_l1(nrm(pdist(student)) - nrm(pdist(teacher))))
    return angle_ratio * angle + dist_ratio * dist


if __name__ == "__main__":
    key = jax.random.PRNGKey(0)
    k_t, k_s = jax.random.split(key)
    N, D = 8, 32  # batch of 8 embeddings, feature dim 32
    teacher = jax.random.normal(k_t, (N, D), dtype=jnp.float32)
    student = jax.random.normal(k_s, (N, D), dtype=jnp.float32)

    loss = rkd_loss(teacher, student, dist_ratio=0.5, angle_ratio=0.5,
                    normalize=True)
    loss = jax.block_until_ready(loss)

    ref = rkd_loss_reference(teacher, student)
    np.testing.assert_allclose(np.asarray(loss), np.asarray(ref),
                               rtol=5e-4, atol=1e-6)
    print("KERNEL_OK")
</pallas_src>

<mosaic_0001>
module attributes {stable_mosaic.version = 11 : i64} {
  func.func @rkd_kernel(%arg0: i32, %arg1: memref<8x32xf32, #tpu.memory_space<vmem>>, %arg2: memref<8x32xf32, #tpu.memory_space<vmem>>, %arg3: memref<1x1xf32, #tpu.memory_space<smem>>, %arg4: memref<8x8xf32, #tpu.memory_space<vmem>>, %arg5: memref<8x8xf32, #tpu.memory_space<vmem>>, %arg6: memref<8x1xf32, #tpu.memory_space<vmem>>, %arg7: memref<8x1xf32, #tpu.memory_space<vmem>>) attributes {dimension_semantics = [#tpu.dimension_semantics<arbitrary>], iteration_bounds = array<i64: 1>, scalar_prefetch = 0 : i64, scratch_operands = 4 : i64, tpu.core_type = #tpu.core_type<tc>, window_params = [{transform_indices = @transform_0, window_bounds = array<i64: 8, 32>}, {transform_indices = @transform_1, window_bounds = array<i64: 8, 32>}, {transform_indices = @transform_2, window_bounds = array<i64: 1, 1>}]} {
    %c0_i32 = arith.constant 0 : i32
    %0 = arith.cmpi eq, %arg0, %c0_i32 : i32
    %1 = arith.extui %0 : i1 to i32
    %c0_i32_0 = arith.constant 0 : i32
    %2 = arith.cmpi ne, %1, %c0_i32_0 : i32
    scf.if %2 {
      %cst_19 = arith.constant 0.000000e+00 : f32
      %18 = vector.broadcast %cst_19 : f32 to vector<8x8xf32>
      %c0_20 = arith.constant 0 : index
      %c0_21 = arith.constant 0 : index
      %19 = vector.load %arg4[%c0_20, %c0_21] : memref<8x8xf32, #tpu.memory_space<vmem>>, vector<8x8xf32>
      tpu.vector_store %arg4[%c0_20, %c0_21], %18 {strides = array<i32>} : memref<8x8xf32, #tpu.memory_space<vmem>>, vector<8x8xf32>,
      %cst_22 = arith.constant 0.000000e+00 : f32
      %20 = vector.broadcast %cst_22 : f32 to vector<8x8xf32>
      %c0_23 = arith.constant 0 : index
      %c0_24 = arith.constant 0 : index
      %21 = vector.load %arg5[%c0_23, %c0_24] : memref<8x8xf32, #tpu.memory_space<vmem>>, vector<8x8xf32>
      tpu.vector_store %arg5[%c0_23, %c0_24], %20 {strides = array<i32>} : memref<8x8xf32, #tpu.memory_space<vmem>>, vector<8x8xf32>,
    } else {
    }
    %c0 = arith.constant 0 : index
    %c0_1 = arith.constant 0 : index
    %3 = vector.load %arg4[%c0, %c0_1] : memref<8x8xf32, #tpu.memory_space<vmem>>, vector<8x8xf32>
    %c0_2 = arith.constant 0 : index
    %c0_3 = arith.constant 0 : index
    %4 = vector.load %arg1[%c0_2, %c0_3] : memref<8x32xf32, #tpu.memory_space<vmem>>, vector<8x32xf32>
    %c0_4 = arith.constant 0 : index
    %c0_5 = arith.constant 0 : index
    %5 = vector.load %arg1[%c0_4, %c0_5] : memref<8x32xf32, #tpu.memory_space<vmem>>, vector<8x32xf32>
    %cst = arith.constant dense<0.000000e+00> : vector<8x8xf32>
    %6 = tpu.matmul %4, %5, %cst {dimension_numbers = #tpu.dot_dimension_numbers<[1], [1], [0], [0], [0, 0, 1, 0], [], []>} : vector<8x32xf32>, vector<8x32xf32>, vector<8x8xf32> -> vector<8x8xf32>
    %7 = arith.addf %3, %6 : vector<8x8xf32>
    %c0_6 = arith.constant 0 : index
    %c0_7 = arith.constant 0 : index
    %8 = vector.load %arg4[%c0_6, %c0_7] : memref<8x8xf32, #tpu.memory_space<vmem>>, vector<8x8xf32>
    tpu.vector_store %arg4[%c0_6, %c0_7], %7 {strides = array<i32>} : memref<8x8xf32, #tpu.memory_space<vmem>>, vector<8x8xf32>,
    %c0_8 = arith.constant 0 : index
    %c0_9 = arith.constant 0 : index
    %9 = vector.load %arg5[%c0_8, %c0_9] : memref<8x8xf32, #tpu.memory_space<vmem>>, vector<8x8xf32>
    %c0_10 = arith.constant 0 : index
    %c0_11 = arith.constant 0 : index
    %10 = vector.load %arg2[%c0_10, %c0_11] : memref<8x32xf32, #tpu.memory_space<vmem>>, vector<8x32xf32>
    %c0_12 = arith.constant 0 : index
    %c0_13 = arith.constant 0 : index
    %11 = vector.load %arg2[%c0_12, %c0_13] : memref<8x32xf32, #tpu.memory_space<vmem>>, vector<8x32xf32>
    %cst_14 = arith.constant dense<0.000000e+00> : vector<8x8xf32>
    %12 = tpu.matmul %10, %11, %cst_14 {dimension_numbers = #tpu.dot_dimension_numbers<[1], [1], [0], [0], [0, 0, 1, 0], [], []>} : vector<8x32xf32>, vector<8x32xf32>, vector<8x8xf32> -> vector<8x8xf32>
    %13 = arith.addf %9, %12 : vector<8x8xf32>
    %c0_15 = arith.constant 0 : index
    %c0_16 = arith.constant 0 : index
    %14 = vector.load %arg5[%c0_15, %c0_16] : memref<8x8xf32, #tpu.memory_space<vmem>>, vector<8x8xf32>
    tpu.vector_store %arg5[%c0_15, %c0_16], %13 {strides = array<i32>} : memref<8x8xf32, #tpu.memory_space<vmem>>, vector<8x8xf32>,
    %c0_i32_17 = arith.constant 0 : i32
    %15 = arith.cmpi eq, %arg0, %c0_i32_17 : i32
    %16 = arith.extui %15 : i1 to i32
    %c0_i32_18 = arith.constant 0 : i32
    %17 = arith.cmpi ne, %16, %c0_i32_18 : i32
    scf.if %17 {
      %c0_19 = arith.constant 0 : index
      %c0_20 = arith.constant 0 : index
      %18 = vector.load %arg4[%c0_19, %c0_20] : memref<8x8xf32, #tpu.memory_space<vmem>>, vector<8x8xf32>
      %c0_21 = arith.constant 0 : index
      %c0_22 = arith.constant 0 : index
      %19 = vector.load %arg5[%c0_21, %c0_22] : memref<8x8xf32, #tpu.memory_space<vmem>>, vector<8x8xf32>
      %20 = tpu.iota {dimensions = array<i32: 0>} : vector<8x8xi32>
      %21 = tpu.iota {dimensions = array<i32: 1>} : vector<8x8xi32>
      %22 = arith.cmpi eq, %20, %21 : vector<8x8xi32>
      %cst_23 = arith.constant 0.000000e+00 : f32
      %23 = vector.broadcast %cst_23 : f32 to vector<8x8xf32>
      %24 = arith.select %22, %18, %23 : vector<8x8xi1>, vector<8x8xf32>
      %cst_24 = arith.constant dense<0.000000e+00> : vector<8xf32>
      %25 = vector.multi_reduction <add>, %24, %cst_24 [0] : vector<8x8xf32> to vector<8xf32>
      %26 = vector.shape_cast %25 : vector<8xf32> to vector<1x8xf32>
      %cst_25 = arith.constant dense<0.000000e+00> : vector<8xf32>
      %27 = vector.multi_reduction <add>, %24, %cst_25 [1] : vector<8x8xf32> to vector<8xf32>
      %28 = vector.shape_cast %27 : vector<8xf32> to vector<8x1xf32>
      %cst_26 = arith.constant 0.000000e+00 : f32
      %29 = vector.broadcast %cst_26 : f32 to vector<8x8xf32>
      %30 = arith.select %22, %19, %29 : vector<8x8xi1>, vector<8x8xf32>
      %cst_27 = arith.constant dense<0.000000e+00> : vector<8xf32>
      %31 = vector.multi_reduction <add>, %30, %cst_27 [0] : vector<8x8xf32> to vector<8xf32>
      %32 = vector.shape_cast %31 : vector<8xf32> to vector<1x8xf32>
      %cst_28 = arith.constant dense<0.000000e+00> : vector<8xf32>
      %33 = vector.multi_reduction <add>, %30, %cst_28 [1] : vector<8x8xf32> to vector<8xf32>
      %34 = vector.shape_cast %33 : vector<8xf32> to vector<8x1xf32>
      %c0_29 = arith.constant 0 : index
      %c0_30 = arith.constant 0 : index
      %35 = vector.load %arg6[%c0_29, %c0_30] : memref<8x1xf32, #tpu.memory_space<vmem>>, vector<8x1xf32>
      tpu.vector_store %arg6[%c0_29, %c0_30], %28 {strides = array<i32>} : memref<8x1xf32, #tpu.memory_space<vmem>>, vector<8x1xf32>,
      %c0_31 = arith.constant 0 : index
      %c0_32 = arith.constant 0 : index
      %36 = vector.load %arg7[%c0_31, %c0_32] : memref<8x1xf32, #tpu.memory_space<vmem>>, vector<8x1xf32>
      tpu.vector_store %arg7[%c0_31, %c0_32], %34 {strides = array<i32>} : memref<8x1xf32, #tpu.memory_space<vmem>>, vector<8x1xf32>,
      %37 = vector.broadcast %26 : vector<1x8xf32> to vector<8x8xf32>
      %38 = vector.broadcast %28 : vector<8x1xf32> to vector<8x8xf32>
      %39 = arith.addf %37, %38 : vector<8x8xf32>
      %cst_33 = arith.constant 2.000000e+00 : f32
      %40 = vector.broadcast %cst_33 : f32 to vector<8x8xf32>
      %41 = arith.mulf %40, %18 : vector<8x8xf32>
      %42 = arith.subf %39, %41 : vector<8x8xf32>
      %cst_34 = arith.constant 1.000000e-10 : f32
      %43 = vector.broadcast %cst_34 : f32 to vector<8x8xf32>
      %44 = arith.maximumf %42, %43 : vector<8x8xf32>
      %45 = math.sqrt %44 : vector<8x8xf32>
      %cst_35 = arith.constant 0.000000e+00 : f32
      %46 = vector.broadcast %cst_35 : f32 to vector<8x8xf32>
      %47 = arith.select %22, %46, %45 : vector<8x8xi1>, vector<8x8xf32>
      %48 = vector.shape_cast %47 : vector<8x8xf32> to vector<1x8x8xf32>
      %cst_36 = arith.constant dense<0.000000e+00> : vector<1xf32>
      %49 = vector.multi_reduction <add>, %48, %cst_36 [1, 2] : vector<1x8x8xf32> to vector<1xf32>
      %50 = vector.shape_cast %49 : vector<1xf32> to vector<1x1x1xf32>
      %51 = vector.extract %50[0, 0, 0] : f32 from vector<1x1x1xf32>
      %cst_37 = arith.constant 0.0178571437 : f32
      %52 = arith.mulf %51, %cst_37 : f32
      %cst_38 = arith.constant 1.000000e-07 : f32
      %53 = arith.addf %52, %cst_38 : f32
      %54 = vector.broadcast %53 : f32 to vector<8x8xf32>
      %55 = arith.divf %47, %54 : vector<8x8xf32>
      %56 = vector.broadcast %32 : vector<1x8xf32> to vector<8x8xf32>
      %57 = vector.broadcast %34 : vector<8x1xf32> to vector<8x8xf32>
      %58 = arith.addf %56, %57 : vector<8x8xf32>
      %cst_39 = arith.constant 2.000000e+00 : f32
      %59 = vector.broadcast %cst_39 : f32 to vector<8x8xf32>
      %60 = arith.mulf %59, %19 : vector<8x8xf32>
      %61 = arith.subf %58, %60 : vector<8x8xf32>
      %cst_40 = arith.constant 1.000000e-10 : f32
      %62 = vector.broadcast %cst_40 : f32 to vector<8x8xf32>
      %63 = arith.maximumf %61, %62 : vector<8x8xf32>
      %64 = math.sqrt %63 : vector<8x8xf32>
      %cst_41 = arith.constant 0.000000e+00 : f32
      %65 = vector.broadcast %cst_41 : f32 to vector<8x8xf32>
      %66 = arith.select %22, %65, %64 : vector<8x8xi1>, vector<8x8xf32>
      %67 = vector.shape_cast %66 : vector<8x8xf32> to vector<1x8x8xf32>
      %cst_42 = arith.constant dense<0.000000e+00> : vector<1xf32>
      %68 = vector.multi_reduction <add>, %67, %cst_42 [1, 2] : vector<1x8x8xf32> to vector<1xf32>
      %69 = vector.shape_cast %68 : vector<1xf32> to vector<1x1x1xf32>
      %70 = vector.extract %69[0, 0, 0] : f32 from vector<1x1x1xf32>
      %cst_43 = arith.constant 0.0178571437 : f32
      %71 = arith.mulf %70, %cst_43 : f32
      %cst_44 = arith.constant 1.000000e-07 : f32
      %72 = arith.addf %71, %cst_44 : f32
      %73 = vector.broadcast %72 : f32 to vector<8x8xf32>
      %74 = arith.divf %66, %73 : vector<8x8xf32>
      %75 = arith.subf %74, %55 : vector<8x8xf32>
      %76 = math.absf %75 : vector<8x8xf32>
      %cst_45 = arith.constant 1.000000e+00 : f32
      %77 = vector.broadcast %cst_45 : f32 to vector<8x8xf32>
      %78 = arith.cmpf olt, %76, %77 : vector<8x8xf32>
      %cst_46 = arith.constant 5.000000e-01 : f32
      %79 = vector.broadcast %cst_46 : f32 to vector<8x8xf32>
      %80 = arith.mulf %79, %75 : vector<8x8xf32>
      %81 = arith.mulf %80, %75 : vector<8x8xf32>
      %cst_47 = arith.constant 5.000000e-01 : f32
      %82 = vector.broadcast %cst_47 : f32 to vector<8x8xf32>
      %83 = arith.subf %76, %82 : vector<8x8xf32>
      %84 = arith.select %78, %81, %83 : vector<8x8xi1>, vector<8x8xf32>
      %85 = vector.shape_cast %84 : vector<8x8xf32> to vector<1x8x8xf32>
      %cst_48 = arith.constant dense<0.000000e+00> : vector<1xf32>
      %86 = vector.multi_reduction <add>, %85, %cst_48 [1, 2] : vector<1x8x8xf32> to vector<1xf32>
      %87 = vector.shape_cast %86 : vector<1xf32> to vector<1x1x1xf32>
      %88 = vector.extract %87[0, 0, 0] : f32 from vector<1x1x1xf32>
      %cst_49 = arith.constant 1.562500e-02 : f32
      %89 = arith.mulf %88, %cst_49 : f32
      %90 = tpu.iota {dimensions = array<i32: 0>} : vector<8x1xi32>
      %cst_50 = arith.constant 0.000000e+00 : f32
      %91 = vector.broadcast %cst_50 : f32 to vector<8x8xf32>
      %c0_i32_51 = arith.constant 0 : i32
      %92 = vector.broadcast %c0_i32_51 : i32 to vector<8x1xi32>
      %93 = arith.cmpi eq, %90, %92 : vector<8x1xi32>
      %94 = arith.extui %93 : vector<8x1xi1> to vector<8x1xi32>
      %95 = arith.sitofp %94 : vector<8x1xi32> to vector<8x1xf32>
      %96 = vector.broadcast %c0_i32_51 : i32 to vector<8x8xi32>
      %97 = arith.cmpi ne, %20, %96 : vector<8x8xi32>
      %98 = vector.broadcast %c0_i32_51 : i32 to vector<8x8xi32>
      %99 = arith.cmpi ne, %21, %98 : vector<8x8xi32>
      %100 = arith.andi %97, %99 : vector<8x8xi1>
      %101 = arith.index_cast %c0_i32_51 : i32 to index
      %c0_52 = arith.constant 0 : index
      %102 = vector.load %arg4[%101, %c0_52] : memref<8x8xf32, #tpu.memory_space<vmem>>, vector<1x8xf32>
      %103 = arith.index_cast %c0_i32_51 : i32 to index
      %c0_53 = arith.constant 0 : index
      %104 = vector.load %arg6[%103, %c0_53] : memref<8x1xf32, #tpu.memory_space<vmem>>, vector<1x1xf32>
      %cst_54 = arith.constant dense<0.000000e+00> : vector<8x1xf32>
      %105 = tpu.matmul %18, %95, %cst_54 {dimension_numbers = #tpu.dot_dimension_numbers<[1], [0], [0], [1], [0, 0, 1, 1], [], []>} : vector<8x8xf32>, vector<8x1xf32>, vector<8x1xf32> -> vector<8x1xf32>
      %106 = vector.broadcast %105 : vector<8x1xf32> to vector<8x8xf32>
      %107 = arith.subf %18, %106 : vector<8x8xf32>
      %108 = vector.broadcast %102 : vector<1x8xf32> to vector<8x8xf32>
      %109 = arith.subf %107, %108 : vector<8x8xf32>
      %110 = vector.broadcast %104 : vector<1x1xf32> to vector<8x8xf32>
      %111 = arith.addf %109, %110 : vector<8x8xf32>
      %112 = vector.broadcast %104 : vector<1x1xf32> to vector<1x8xf32>
      %113 = arith.addf %26, %112 : vector<1x8xf32>
      %cst_55 = arith.constant 2.000000e+00 : f32
      %114 = vector.broadcast %cst_55 : f32 to vector<1x8xf32>
      %115 = arith.mulf %114, %102 : vector<1x8xf32>
      %116 = arith.subf %113, %115 : vector<1x8xf32>
      %cst_56 = arith.constant 1.000000e-24 : f32
      %117 = vector.broadcast %cst_56 : f32 to vector<1x8xf32>
      %118 = arith.maximumf %116, %117 : vector<1x8xf32>
      %119 = math.rsqrt %118 : vector<1x8xf32>
      %120 = vector.broadcast %104 : vector<1x1xf32> to vector<8x1xf32>
      %121 = arith.addf %28, %120 : vector<8x1xf32>
      %cst_57 = arith.constant 2.000000e+00 : f32
      %122 = vector.broadcast %cst_57 : f32 to vector<8x1xf32>
      %123 = arith.mulf %122, %105 : vector<8x1xf32>
      %124 = arith.subf %121, %123 : vector<8x1xf32>
      %cst_58 = arith.constant 1.000000e-24 : f32
      %125 = vector.broadcast %cst_58 : f32 to vector<8x1xf32>
      %126 = arith.maximumf %124, %125 : vector<8x1xf32>
      %127 = math.rsqrt %126 : vector<8x1xf32>
      %128 = vector.broadcast %127 : vector<8x1xf32> to vector<8x8xf32>
      %129 = arith.mulf %111, %128 : vector<8x8xf32>
      %130 = vector.broadcast %119 : vector<1x8xf32> to vector<8x8xf32>
      %131 = arith.mulf %129, %130 : vector<8x8xf32>
      %cst_59 = arith.constant 0.000000e+00 : f32
      %132 = vector.broadcast %cst_59 : f32 to vector<8x8xf32>
      %133 = arith.select %100, %131, %132 : vector<8x8xi1>, vector<8x8xf32>
      %134 = arith.index_cast %c0_i32_51 : i32 to index
      %c0_60 = arith.constant 0 : index
      %135 = vector.load %arg5[%134, %c0_60] : memref<8x8xf32, #tpu.memory_space<vmem>>, vector<1x8xf32>
      %136 = arith.index_cast %c0_i32_51 : i32 to index
      %c0_61 = arith.constant 0 : index
      %137 = vector.load %arg7[%136, %c0_61] : memref<8x1xf32, #tpu.memory_space<vmem>>, vector<1x1xf32>
      %cst_62 = arith.constant dense<0.000000e+00> : vector<8x1xf32>
      %138 = tpu.matmul %19, %95, %cst_62 {dimension_numbers = #tpu.dot_dimension_numbers<[1], [0], [0], [1], [0, 0, 1, 1], [], []>} : vector<8x8xf32>, vector<8x1xf32>, vector<8x1xf32> -> vector<8x1xf32>
      %139 = vector.broadcast %138 : vector<8x1xf32> to vector<8x8xf32>
      %140 = arith.subf %19, %139 : vector<8x8xf32>
      %141 = vector.broadcast %135 : vector<1x8xf32> to vector<8x8xf32>
      %142 = arith.subf %140, %141 : vector<8x8xf32>
      %143 = vector.broadcast %137 : vector<1x1xf32> to vector<8x8xf32>
      %144 = arith.addf %142, %143 : vector<8x8xf32>
      %145 = vector.broadcast %137 : vector<1x1xf32> to vector<1x8xf32>
      %146 = arith.addf %32, %145 : vector<1x8xf32>
      %cst_63 = arith.constant 2.000000e+00 : f32
      %147 = vector.broadcast %cst_63 : f32 to vector<1x8xf32>
      %148 = arith.mulf %147, %135 : vector<1x8xf32>
      %149 = arith.subf %146, %148 : vector<1x8xf32>
      %cst_64 = arith.constant 1.000000e-24 : f32
      %150 = vector.broadcast %cst_64 : f32 to vector<1x8xf32>
      %151 = arith.maximumf %149, %150 : vector<1x8xf32>
      %152 = math.rsqrt %151 : vector<1x8xf32>
      %153 = vector.broadcast %137 : vector<1x1xf32> to vector<8x1xf32>
      %154 = arith.addf %34, %153 : vector<8x1xf32>
      %cst_65 = arith.constant 2.000000e+00 : f32
      %155 = vector.broadcast %cst_65 : f32 to vector<8x1xf32>
      %156 = arith.mulf %155, %138 : vector<8x1xf32>
      %157 = arith.subf %154, %156 : vector<8x1xf32>
      %cst_66 = arith.constant 1.000000e-24 : f32
      %158 = vector.broadcast %cst_66 : f32 to vector<8x1xf32>
      %159 = arith.maximumf %157, %158 : vector<8x1xf32>
      %160 = math.rsqrt %159 : vector<8x1xf32>
      %161 = vector.broadcast %160 : vector<8x1xf32> to vector<8x8xf32>
      %162 = arith.mulf %144, %161 : vector<8x8xf32>
      %163 = vector.broadcast %152 : vector<1x8xf32> to vector<8x8xf32>
      %164 = arith.mulf %162, %163 : vector<8x8xf32>
      %cst_67 = arith.constant 0.000000e+00 : f32
      %165 = vector.broadcast %cst_67 : f32 to vector<8x8xf32>
      %166 = arith.select %100, %164, %165 : vector<8x8xi1>, vector<8x8xf32>
      %167 = arith.subf %166, %133 : vector<8x8xf32>
      %168 = math.absf %167 : vector<8x8xf32>
      %cst_68 = arith.constant 1.000000e+00 : f32
      %169 = vector.broadcast %cst_68 : f32 to vector<8x8xf32>
      %170 = arith.cmpf olt, %168, %169 : vector<8x8xf32>
      %cst_69 = arith.constant 5.000000e-01 : f32
      %171 = vector.broadcast %cst_69 : f32 to vector<8x8xf32>
      %172 = arith.mulf %171, %167 : vector<8x8xf32>
      %173 = arith.mulf %172, %167 : vector<8x8xf32>
      %cst_70 = arith.constant 5.000000e-01 : f32
      %174 = vector.broadcast %cst_70 : f32 to vector<8x8xf32>
      %175 = arith.subf %168, %174 : vector<8x8xf32>
      %176 = arith.select %170, %173, %175 : vector<8x8xi1>, vector<8x8xf32>
      %177 = arith.addf %91, %176 : vector<8x8xf32>
      %c1_i32 = arith.constant 1 : i32
      %178 = vector.broadcast %c1_i32 : i32 to vector<8x1xi32>
      %179 = arith.cmpi eq, %90, %178 : vector<8x1xi32>
      %180 = arith.extui %179 : vector<8x1xi1> to vector<8x1xi32>
      %181 = arith.sitofp %180 : vector<8x1xi32> to vector<8x1xf32>
      %182 = vector.broadcast %c1_i32 : i32 to vector<8x8xi32>
      %183 = arith.cmpi ne, %20, %182 : vector<8x8xi32>
      %184 = vector.broadcast %c1_i32 : i32 to vector<8x8xi32>
      %185 = arith.cmpi ne, %21, %184 : vector<8x8xi32>
      %186 = arith.andi %183, %185 : vector<8x8xi1>
      %187 = arith.index_cast %c1_i32 : i32 to index
      %c0_71 = arith.constant 0 : index
      %188 = vector.load %arg4[%187, %c0_71] : memref<8x8xf32, #tpu.memory_space<vmem>>, vector<1x8xf32>
      %189 = arith.index_cast %c1_i32 : i32 to index
      %c0_72 = arith.constant 0 : index
      %190 = vector.load %arg6[%189, %c0_72] : memref<8x1xf32, #tpu.memory_space<vmem>>, vector<1x1xf32>
      %cst_73 = arith.constant dense<0.000000e+00> : vector<8x1xf32>
      %191 = tpu.matmul %18, %181, %cst_73 {dimension_numbers = #tpu.dot_dimension_numbers<[1], [0], [0], [1], [0, 0, 1, 1], [], []>} : vector<8x8xf32>, vector<8x1xf32>, vector<8x1xf32> -> vector<8x1xf32>
      %192 = vector.broadcast %191 : vector<8x1xf32> to vector<8x8xf32>
      %193 = arith.subf %18, %192 : vector<8x8xf32>
      %194 = vector.broadcast %188 : vector<1x8xf32> to vector<8x8xf32>
      %195 = arith.subf %193, %194 : vector<8x8xf32>
      %196 = vector.broadcast %190 : vector<1x1xf32> to vector<8x8xf32>
      %197 = arith.addf %195, %196 : vector<8x8xf32>
      %198 = vector.broadcast %190 : vector<1x1xf32> to vector<1x8xf32>
      %199 = arith.addf %26, %198 : vector<1x8xf32>
      %cst_74 = arith.constant 2.000000e+00 : f32
      %200 = vector.broadcast %cst_74 : f32 to vector<1x8xf32>
      %201 = arith.mulf %200, %188 : vector<1x8xf32>
      %202 = arith.subf %199, %201 : vector<1x8xf32>
      %cst_75 = arith.constant 1.000000e-24 : f32
      %203 = vector.broadcast %cst_75 : f32 to vector<1x8xf32>
      %204 = arith.maximumf %202, %203 : vector<1x8xf32>
      %205 = math.rsqrt %204 : vector<1x8xf32>
      %206 = vector.broadcast %190 : vector<1x1xf32> to vector<8x1xf32>
      %207 = arith.addf %28, %206 : vector<8x1xf32>
      %cst_76 = arith.constant 2.000000e+00 : f32
      %208 = vector.broadcast %cst_76 : f32 to vector<8x1xf32>
      %209 = arith.mulf %208, %191 : vector<8x1xf32>
      %210 = arith.subf %207, %209 : vector<8x1xf32>
      %cst_77 = arith.constant 1.000000e-24 : f32
      %211 = vector.broadcast %cst_77 : f32 to vector<8x1xf32>
      %212 = arith.maximumf %210, %211 : vector<8x1xf32>
      %213 = math.rsqrt %212 : vector<8x1xf32>
      %214 = vector.broadcast %213 : vector<8x1xf32> to vector<8x8xf32>
      %215 = arith.mulf %197, %214 : vector<8x8xf32>
      %216 = vector.broadcast %205 : vector<1x8xf32> to vector<8x8xf32>
      %217 = arith.mulf %215, %216 : vector<8x8xf32>
      %cst_78 = arith.constant 0.000000e+00 : f32
      %218 = vector.broadcast %cst_78 : f32 to vector<8x8xf32>
      %219 = arith.select %186, %217, %218 : vector<8x8xi1>, vector<8x8xf32>
      %220 = arith.index_cast %c1_i32 : i32 to index
      %c0_79 = arith.constant 0 : index
      %221 = vector.load %arg5[%220, %c0_79] : memref<8x8xf32, #tpu.memory_space<vmem>>, vector<1x8xf32>
      %222 = arith.index_cast %c1_i32 : i32 to index
      %c0_80 = arith.constant 0 : index
      %223 = vector.load %arg7[%222, %c0_80] : memref<8x1xf32, #tpu.memory_space<vmem>>, vector<1x1xf32>
      %cst_81 = arith.constant dense<0.000000e+00> : vector<8x1xf32>
      %224 = tpu.matmul %19, %181, %cst_81 {dimension_numbers = #tpu.dot_dimension_numbers<[1], [0], [0], [1], [0, 0, 1, 1], [], []>} : vector<8x8xf32>, vector<8x1xf32>, vector<8x1xf32> -> vector<8x1xf32>
      %225 = vector.broadcast %224 : vector<8x1xf32> to vector<8x8xf32>
      %226 = arith.subf %19, %225 : vector<8x8xf32>
      %227 = vector.broadcast %221 : vector<1x8xf32> to vector<8x8xf32>
      %228 = arith.subf %226, %227 : vector<8x8xf32>
      %229 = vector.broadcast %223 : vector<1x1xf32> to vector<8x8xf32>
      %230 = arith.addf %228, %229 : vector<8x8xf32>
      %231 = vector.broadcast %223 : vector<1x1xf32> to vector<1x8xf32>
      %232 = arith.addf %32, %231 : vector<1x8xf32>
      %cst_82 = arith.constant 2.000000e+00 : f32
      %233 = vector.broadcast %cst_82 : f32 to vector<1x8xf32>
      %234 = arith.mulf %233, %221 : vector<1x8xf32>
      %235 = arith.subf %232, %234 : vector<1x8xf32>
      %cst_83 = arith.constant 1.000000e-24 : f32
      %236 = vector.broadcast %cst_83 : f32 to vector<1x8xf32>
      %237 = arith.maximumf %235, %236 : vector<1x8xf32>
      %238 = math.rsqrt %237 : vector<1x8xf32>
      %239 = vector.broadcast %223 : vector<1x1xf32> to vector<8x1xf32>
      %240 = arith.addf %34, %239 : vector<8x1xf32>
      %cst_84 = arith.constant 2.000000e+00 : f32
      %241 = vector.broadcast %cst_84 : f32 to vector<8x1xf32>
      %242 = arith.mulf %241, %224 : vector<8x1xf32>
      %243 = arith.subf %240, %242 : vector<8x1xf32>
      %cst_85 = arith.constant 1.000000e-24 : f32
      %244 = vector.broadcast %cst_85 : f32 to vector<8x1xf32>
      %245 = arith.maximumf %243, %244 : vector<8x1xf32>
      %246 = math.rsqrt %245 : vector<8x1xf32>
      %247 = vector.broadcast %246 : vector<8x1xf32> to vector<8x8xf32>
      %248 = arith.mulf %230, %247 : vector<8x8xf32>
      %249 = vector.broadcast %238 : vector<1x8xf32> to vector<8x8xf32>
      %250 = arith.mulf %248, %249 : vector<8x8xf32>
      %cst_86 = arith.constant 0.000000e+00 : f32
      %251 = vector.broadcast %cst_86 : f32 to vector<8x8xf32>
      %252 = arith.select %186, %250, %251 : vector<8x8xi1>, vector<8x8xf32>
      %253 = arith.subf %252, %219 : vector<8x8xf32>
      %254 = math.absf %253 : vector<8x8xf32>
      %cst_87 = arith.constant 1.000000e+00 : f32
      %255 = vector.broadcast %cst_87 : f32 to vector<8x8xf32>
      %256 = arith.cmpf olt, %254, %255 : vector<8x8xf32>
      %cst_88 = arith.constant 5.000000e-01 : f32
      %257 = vector.broadcast %cst_88 : f32 to vector<8x8xf32>
      %258 = arith.mulf %257, %253 : vector<8x8xf32>
      %259 = arith.mulf %258, %253 : vector<8x8xf32>
      %cst_89 = arith.constant 5.000000e-01 : f32
      %260 = vector.broadcast %cst_89 : f32 to vector<8x8xf32>
      %261 = arith.subf %254, %260 : vector<8x8xf32>
      %262 = arith.select %256, %259, %261 : vector<8x8xi1>, vector<8x8xf32>
      %263 = arith.addf %177, %262 : vector<8x8xf32>
      %c2_i32 = arith.constant 2 : i32
      %264 = vector.broadcast %c2_i32 : i32 to vector<8x1xi32>
      %265 = arith.cmpi eq, %90, %264 : vector<8x1xi32>
      %266 = arith.extui %265 : vector<8x1xi1> to vector<8x1xi32>
      %267 = arith.sitofp %266 : vector<8x1xi32> to vector<8x1xf32>
      %268 = vector.broadcast %c2_i32 : i32 to vector<8x8xi32>
      %269 = arith.cmpi ne, %20, %268 : vector<8x8xi32>
      %270 = vector.broadcast %c2_i32 : i32 to vector<8x8xi32>
      %271 = arith.cmpi ne, %21, %270 : vector<8x8xi32>
      %272 = arith.andi %269, %271 : vector<8x8xi1>
      %273 = arith.index_cast %c2_i32 : i32 to index
      %c0_90 = arith.constant 0 : index
      %274 = vector.load %arg4[%273, %c0_90] : memref<8x8xf32, #tpu.memory_space<vmem>>, vector<1x8xf32>
      %275 = arith.index_cast %c2_i32 : i32 to index
      %c0_91 = arith.constant 0 : index
      %276 = vector.load %arg6[%275, %c0_91] : memref<8x1xf32, #tpu.memory_space<vmem>>, vector<1x1xf32>
      %cst_92 = arith.constant dense<0.000000e+00> : vector<8x1xf32>
      %277 = tpu.matmul %18, %267, %cst_92 {dimension_numbers = #tpu.dot_dimension_numbers<[1], [0], [0], [1], [0, 0, 1, 1], [], []>} : vector<8x8xf32>, vector<8x1xf32>, vector<8x1xf32> -> vector<8x1xf32>
      %278 = vector.broadcast %277 : vector<8x1xf32> to vector<8x8xf32>
      %279 = arith.subf %18, %278 : vector<8x8xf32>
      %280 = vector.broadcast %274 : vector<1x8xf32> to vector<8x8xf32>
      %281 = arith.subf %279, %280 : vector<8x8xf32>
      %282 = vector.broadcast %276 : vector<1x1xf32> to vector<8x8xf32>
      %283 = arith.addf %281, %282 : vector<8x8xf32>
      %284 = vector.broadcast %276 : vector<1x1xf32> to vector<1x8xf32>
      %285 = arith.addf %26, %284 : vector<1x8xf32>
      %cst_93 = arith.constant 2.000000e+00 : f32
      %286 = vector.broadcast %cst_93 : f32 to vector<1x8xf32>
      %287 = arith.mulf %286, %274 : vector<1x8xf32>
      %288 = arith.subf %285, %287 : vector<1x8xf32>
      %cst_94 = arith.constant 1.000000e-24 : f32
      %289 = vector.broadcast %cst_94 : f32 to vector<1x8xf32>
      %290 = arith.maximumf %288, %289 : vector<1x8xf32>
      %291 = math.rsqrt %290 : vector<1x8xf32>
      %292 = vector.broadcast %276 : vector<1x1xf32> to vector<8x1xf32>
      %293 = arith.addf %28, %292 : vector<8x1xf32>
      %cst_95 = arith.constant 2.000000e+00 : f32
      %294 = vector.broadcast %cst_95 : f32 to vector<8x1xf32>
      %295 = arith.mulf %294, %277 : vector<8x1xf32>
      %296 = arith.subf %293, %295 : vector<8x1xf32>
      %cst_96 = arith.constant 1.000000e-24 : f32
      %297 = vector.broadcast %cst_96 : f32 to vector<8x1xf32>
      %298 = arith.maximumf %296, %297 : vector<8x1xf32>
      %299 = math.rsqrt %298 : vector<8x1xf32>
      %300 = vector.broadcast %299 : vector<8x1xf32> to vector<8x8xf32>
      %301 = arith.mulf %283, %300 : vector<8x8xf32>
      %302 = vector.broadcast %291 : vector<1x8xf32> to vector<8x8xf32>
      %303 = arith.mulf %301, %302 : vector<8x8xf32>
      %cst_97 = arith.constant 0.000000e+00 : f32
      %304 = vector.broadcast %cst_97 : f32 to vector<8x8xf32>
      %305 = arith.select %272, %303, %304 : vector<8x8xi1>, vector<8x8xf32>
      %306 = arith.index_cast %c2_i32 : i32 to index
      %c0_98 = arith.constant 0 : index
      %307 = vector.load %arg5[%306, %c0_98] : memref<8x8xf32, #tpu.memory_space<vmem>>, vector<1x8xf32>
      %308 = arith.index_cast %c2_i32 : i32 to index
      %c0_99 = arith.constant 0 : index
      %309 = vector.load %arg7[%308, %c0_99] : memref<8x1xf32, #tpu.memory_space<vmem>>, vector<1x1xf32>
      %cst_100 = arith.constant dense<0.000000e+00> : vector<8x1xf32>
      %310 = tpu.matmul %19, %267, %cst_100 {dimension_numbers = #tpu.dot_dimension_numbers<[1], [0], [0], [1], [0, 0, 1, 1], [], []>} : vector<8x8xf32>, vector<8x1xf32>, vector<8x1xf32> -> vector<8x1xf32>
      %311 = vector.broadcast %310 : vector<8x1xf32> to vector<8x8xf32>
      %312 = arith.subf %19, %311 : vector<8x8xf32>
      %313 = vector.broadcast %307 : vector<1x8xf32> to vector<8x8xf32>
      %314 = arith.subf %312, %313 : vector<8x8xf32>
      %315 = vector.broadcast %309 : vector<1x1xf32> to vector<8x8xf32>
      %316 = arith.addf %314, %315 : vector<8x8xf32>
      %317 = vector.broadcast %309 : vector<1x1xf32> to vector<1x8xf32>
      %318 = arith.addf %32, %317 : vector<1x8xf32>
      %cst_101 = arith.constant 2.000000e+00 : f32
      %319 = vector.broadcast %cst_101 : f32 to vector<1x8xf32>
      %320 = arith.mulf %319, %307 : vector<1x8xf32>
      %321 = arith.subf %318, %320 : vector<1x8xf32>
      %cst_102 = arith.constant 1.000000e-24 : f32
      %322 = vector.broadcast %cst_102 : f32 to vector<1x8xf32>
      %323 = arith.maximumf %321, %322 : vector<1x8xf32>
      %324 = math.rsqrt %323 : vector<1x8xf32>
      %325 = vector.broadcast %309 : vector<1x1xf32> to vector<8x1xf32>
      %326 = arith.addf %34, %325 : vector<8x1xf32>
      %cst_103 = arith.constant 2.000000e+00 : f32
      %327 = vector.broadcast %cst_103 : f32 to vector<8x1xf32>
      %328 = arith.mulf %327, %310 : vector<8x1xf32>
      %329 = arith.subf %326, %328 : vector<8x1xf32>
      %cst_104 = arith.constant 1.000000e-24 : f32
      %330 = vector.broadcast %cst_104 : f32 to vector<8x1xf32>
      %331 = arith.maximumf %329, %330 : vector<8x1xf32>
      %332 = math.rsqrt %331 : vector<8x1xf32>
      %333 = vector.broadcast %332 : vector<8x1xf32> to vector<8x8xf32>
      %334 = arith.mulf %316, %333 : vector<8x8xf32>
      %335 = vector.broadcast %324 : vector<1x8xf32> to vector<8x8xf32>
      %336 = arith.mulf %334, %335 : vector<8x8xf32>
      %cst_105 = arith.constant 0.000000e+00 : f32
      %337 = vector.broadcast %cst_105 : f32 to vector<8x8xf32>
      %338 = arith.select %272, %336, %337 : vector<8x8xi1>, vector<8x8xf32>
      %339 = arith.subf %338, %305 : vector<8x8xf32>
      %340 = math.absf %339 : vector<8x8xf32>
      %cst_106 = arith.constant 1.000000e+00 : f32
      %341 = vector.broadcast %cst_106 : f32 to vector<8x8xf32>
      %342 = arith.cmpf olt, %340, %341 : vector<8x8xf32>
      %cst_107 = arith.constant 5.000000e-01 : f32
      %343 = vector.broadcast %cst_107 : f32 to vector<8x8xf32>
      %344 = arith.mulf %343, %339 : vector<8x8xf32>
      %345 = arith.mulf %344, %339 : vector<8x8xf32>
      %cst_108 = arith.constant 5.000000e-01 : f32
      %346 = vector.broadcast %cst_108 : f32 to vector<8x8xf32>
      %347 = arith.subf %340, %346 : vector<8x8xf32>
      %348 = arith.select %342, %345, %347 : vector<8x8xi1>, vector<8x8xf32>
      %349 = arith.addf %263, %348 : vector<8x8xf32>
      %c3_i32 = arith.constant 3 : i32
      %350 = vector.broadcast %c3_i32 : i32 to vector<8x1xi32>
      %351 = arith.cmpi eq, %90, %350 : vector<8x1xi32>
      %352 = arith.extui %351 : vector<8x1xi1> to vector<8x1xi32>
      %353 = arith.sitofp %352 : vector<8x1xi32> to vector<8x1xf32>
      %354 = vector.broadcast %c3_i32 : i32 to vector<8x8xi32>
      %355 = arith.cmpi ne, %20, %354 : vector<8x8xi32>
      %356 = vector.broadcast %c3_i32 : i32 to vector<8x8xi32>
      %357 = arith.cmpi ne, %21, %356 : vector<8x8xi32>
      %358 = arith.andi %355, %357 : vector<8x8xi1>
      %359 = arith.index_cast %c3_i32 : i32 to index
      %c0_109 = arith.constant 0 : index
      %360 = vector.load %arg4[%359, %c0_109] : memref<8x8xf32, #tpu.memory_space<vmem>>, vector<1x8xf32>
      %361 = arith.index_cast %c3_i32 : i32 to index
      %c0_110 = arith.constant 0 : index
      %362 = vector.load %arg6[%361, %c0_110] : memref<8x1xf32, #tpu.memory_space<vmem>>, vector<1x1xf32>
      %cst_111 = arith.constant dense<0.000000e+00> : vector<8x1xf32>
      %363 = tpu.matmul %18, %353, %cst_111 {dimension_numbers = #tpu.dot_dimension_numbers<[1], [0], [0], [1], [0, 0, 1, 1], [], []>} : vector<8x8xf32>, vector<8x1xf32>, vector<8x1xf32> -> vector<8x1xf32>
      %364 = vector.broadcast %363 : vector<8x1xf32> to vector<8x8xf32>
      %365 = arith.subf %18, %364 : vector<8x8xf32>
      %366 = vector.broadcast %360 : vector<1x8xf32> to vector<8x8xf32>
      %367 = arith.subf %365, %366 : vector<8x8xf32>
      %368 = vector.broadcast %362 : vector<1x1xf32> to vector<8x8xf32>
      %369 = arith.addf %367, %368 : vector<8x8xf32>
      %370 = vector.broadcast %362 : vector<1x1xf32> to vector<1x8xf32>
      %371 = arith.addf %26, %370 : vector<1x8xf32>
      %cst_112 = arith.constant 2.000000e+00 : f32
      %372 = vector.broadcast %cst_112 : f32 to vector<1x8xf32>
      %373 = arith.mulf %372, %360 : vector<1x8xf32>
      %374 = arith.subf %371, %373 : vector<1x8xf32>
      %cst_113 = arith.constant 1.000000e-24 : f32
      %375 = vector.broadcast %cst_113 : f32 to vector<1x8xf32>
      %376 = arith.maximumf %374, %375 : vector<1x8xf32>
      %377 = math.rsqrt %376 : vector<1x8xf32>
      %378 = vector.broadcast %362 : vector<1x1xf32> to vector<8x1xf32>
      %379 = arith.addf %28, %378 : vector<8x1xf32>
      %cst_114 = arith.constant 2.000000e+00 : f32
      %380 = vector.broadcast %cst_114 : f32 to vector<8x1xf32>
      %381 = arith.mulf %380, %363 : vector<8x1xf32>
      %382 = arith.subf %379, %381 : vector<8x1xf32>
      %cst_115 = arith.constant 1.000000e-24 : f32
      %383 = vector.broadcast %cst_115 : f32 to vector<8x1xf32>
      %384 = arith.maximumf %382, %383 : vector<8x1xf32>
      %385 = math.rsqrt %384 : vector<8x1xf32>
      %386 = vector.broadcast %385 : vector<8x1xf32> to vector<8x8xf32>
      %387 = arith.mulf %369, %386 : vector<8x8xf32>
      %388 = vector.broadcast %377 : vector<1x8xf32> to vector<8x8xf32>
      %389 = arith.mulf %387, %388 : vector<8x8xf32>
      %cst_116 = arith.constant 0.000000e+00 : f32
      %390 = vector.broadcast %cst_116 : f32 to vector<8x8xf32>
      %391 = arith.select %358, %389, %390 : vector<8x8xi1>, vector<8x8xf32>
      %392 = arith.index_cast %c3_i32 : i32 to index
      %c0_117 = arith.constant 0 : index
      %393 = vector.load %arg5[%392, %c0_117] : memref<8x8xf32, #tpu.memory_space<vmem>>, vector<1x8xf32>
      %394 = arith.index_cast %c3_i32 : i32 to index
      %c0_118 = arith.constant 0 : index
      %395 = vector.load %arg7[%394, %c0_118] : memref<8x1xf32, #tpu.memory_space<vmem>>, vector<1x1xf32>
      %cst_119 = arith.constant dense<0.000000e+00> : vector<8x1xf32>
      %396 = tpu.matmul %19, %353, %cst_119 {dimension_numbers = #tpu.dot_dimension_numbers<[1], [0], [0], [1], [0, 0, 1, 1], [], []>} : vector<8x8xf32>, vector<8x1xf32>, vector<8x1xf32> -> vector<8x1xf32>
      %397 = vector.broadcast %396 : vector<8x1xf32> to vector<8x8xf32>
      %398 = arith.subf %19, %397 : vector<8x8xf32>
      %399 = vector.broadcast %393 : vector<1x8xf32> to vector<8x8xf32>
      %400 = arith.subf %398, %399 : vector<8x8xf32>
      %401 = vector.broadcast %395 : vector<1x1xf32> to vector<8x8xf32>
      %402 = arith.addf %400, %401 : vector<8x8xf32>
      %403 = vector.broadcast %395 : vector<1x1xf32> to vector<1x8xf32>
      %404 = arith.addf %32, %403 : vector<1x8xf32>
      %cst_120 = arith.constant 2.000000e+00 : f32
      %405 = vector.broadcast %cst_120 : f32 to vector<1x8xf32>
      %406 = arith.mulf %405, %393 : vector<1x8xf32>
      %407 = arith.subf %404, %406 : vector<1x8xf32>
      %cst_121 = arith.constant 1.000000e-24 : f32
      %408 = vector.broadcast %cst_121 : f32 to vector<1x8xf32>
      %409 = arith.maximumf %407, %408 : vector<1x8xf32>
      %410 = math.rsqrt %409 : vector<1x8xf32>
      %411 = vector.broadcast %395 : vector<1x1xf32> to vector<8x1xf32>
      %412 = arith.addf %34, %411 : vector<8x1xf32>
      %cst_122 = arith.constant 2.000000e+00 : f32
      %413 = vector.broadcast %cst_122 : f32 to vector<8x1xf32>
      %414 = arith.mulf %413, %396 : vector<8x1xf32>
      %415 = arith.subf %412, %414 : vector<8x1xf32>
      %cst_123 = arith.constant 1.000000e-24 : f32
      %416 = vector.broadcast %cst_123 : f32 to vector<8x1xf32>
      %417 = arith.maximumf %415, %416 : vector<8x1xf32>
      %418 = math.rsqrt %417 : vector<8x1xf32>
      %419 = vector.broadcast %418 : vector<8x1xf32> to vector<8x8xf32>
      %420 = arith.mulf %402, %419 : vector<8x8xf32>
      %421 = vector.broadcast %410 : vector<1x8xf32> to vector<8x8xf32>
      %422 = arith.mulf %420, %421 : vector<8x8xf32>
      %cst_124 = arith.constant 0.000000e+00 : f32
      %423 = vector.broadcast %cst_124 : f32 to vector<8x8xf32>
      %424 = arith.select %358, %422, %423 : vector<8x8xi1>, vector<8x8xf32>
      %425 = arith.subf %424, %391 : vector<8x8xf32>
      %426 = math.absf %425 : vector<8x8xf32>
      %cst_125 = arith.constant 1.000000e+00 : f32
      %427 = vector.broadcast %cst_125 : f32 to vector<8x8xf32>
      %428 = arith.cmpf olt, %426, %427 : vector<8x8xf32>
      %cst_126 = arith.constant 5.000000e-01 : f32
      %429 = vector.broadcast %cst_126 : f32 to vector<8x8xf32>
      %430 = arith.mulf %429, %425 : vector<8x8xf32>
      %431 = arith.mulf %430, %425 : vector<8x8xf32>
      %cst_127 = arith.constant 5.000000e-01 : f32
      %432 = vector.broadcast %cst_127 : f32 to vector<8x8xf32>
      %433 = arith.subf %426, %432 : vector<8x8xf32>
      %434 = arith.select %428, %431, %433 : vector<8x8xi1>, vector<8x8xf32>
      %435 = arith.addf %349, %434 : vector<8x8xf32>
      %c4_i32 = arith.constant 4 : i32
      %436 = vector.broadcast %c4_i32 : i32 to vector<8x1xi32>
      %437 = arith.cmpi eq, %90, %436 : vector<8x1xi32>
      %438 = arith.extui %437 : vector<8x1xi1> to vector<8x1xi32>
      %439 = arith.sitofp %438 : vector<8x1xi32> to vector<8x1xf32>
      %440 = vector.broadcast %c4_i32 : i32 to vector<8x8xi32>
      %441 = arith.cmpi ne, %20, %440 : vector<8x8xi32>
      %442 = vector.broadcast %c4_i32 : i32 to vector<8x8xi32>
      %443 = arith.cmpi ne, %21, %442 : vector<8x8xi32>
      %444 = arith.andi %441, %443 : vector<8x8xi1>
      %445 = arith.index_cast %c4_i32 : i32 to index
      %c0_128 = arith.constant 0 : index
      %446 = vector.load %arg4[%445, %c0_128] : memref<8x8xf32, #tpu.memory_space<vmem>>, vector<1x8xf32>
      %447 = arith.index_cast %c4_i32 : i32 to index
      %c0_129 = arith.constant 0 : index
      %448 = vector.load %arg6[%447, %c0_129] : memref<8x1xf32, #tpu.memory_space<vmem>>, vector<1x1xf32>
      %cst_130 = arith.constant dense<0.000000e+00> : vector<8x1xf32>
      %449 = tpu.matmul %18, %439, %cst_130 {dimension_numbers = #tpu.dot_dimension_numbers<[1], [0], [0], [1], [0, 0, 1, 1], [], []>} : vector<8x8xf32>, vector<8x1xf32>, vector<8x1xf32> -> vector<8x1xf32>
      %450 = vector.broadcast %449 : vector<8x1xf32> to vector<8x8xf32>
      %451 = arith.subf %18, %450 : vector<8x8xf32>
      %452 = vector.broadcast %446 : vector<1x8xf32> to vector<8x8xf32>
      %453 = arith.subf %451, %452 : vector<8x8xf32>
      %454 = vector.broadcast %448 : vector<1x1xf32> to vector<8x8xf32>
      %455 = arith.addf %453, %454 : vector<8x8xf32>
      %456 = vector.broadcast %448 : vector<1x1xf32> to vector<1x8xf32>
      %457 = arith.addf %26, %456 : vector<1x8xf32>
      %cst_131 = arith.constant 2.000000e+00 : f32
      %458 = vector.broadcast %cst_131 : f32 to vector<1x8xf32>
      %459 = arith.mulf %458, %446 : vector<1x8xf32>
      %460 = arith.subf %457, %459 : vector<1x8xf32>
      %cst_132 = arith.constant 1.000000e-24 : f32
      %461 = vector.broadcast %cst_132 : f32 to vector<1x8xf32>
      %462 = arith.maximumf %460, %461 : vector<1x8xf32>
      %463 = math.rsqrt %462 : vector<1x8xf32>
      %464 = vector.broadcast %448 : vector<1x1xf32> to vector<8x1xf32>
      %465 = arith.addf %28, %464 : vector<8x1xf32>
      %cst_133 = arith.constant 2.000000e+00 : f32
      %466 = vector.broadcast %cst_133 : f32 to vector<8x1xf32>
      %467 = arith.mulf %466, %449 : vector<8x1xf32>
      %468 = arith.subf %465, %467 : vector<8x1xf32>
      %cst_134 = arith.constant 1.000000e-24 : f32
      %469 = vector.broadcast %cst_134 : f32 to vector<8x1xf32>
      %470 = arith.maximumf %468, %469 : vector<8x1xf32>
      %471 = math.rsqrt %470 : vector<8x1xf32>
      %472 = vector.broadcast %471 : vector<8x1xf32> to vector<8x8xf32>
      %473 = arith.mulf %455, %472 : vector<8x8xf32>
      %474 = vector.broadcast %463 : vector<1x8xf32> to vector<8x8xf32>
      %475 = arith.mulf %473, %474 : vector<8x8xf32>
      %cst_135 = arith.constant 0.000000e+00 : f32
      %476 = vector.broadcast %cst_135 : f32 to vector<8x8xf32>
      %477 = arith.select %444, %475, %476 : vector<8x8xi1>, vector<8x8xf32>
      %478 = arith.index_cast %c4_i32 : i32 to index
      %c0_136 = arith.constant 0 : index
      %479 = vector.load %arg5[%478, %c0_136] : memref<8x8xf32, #tpu.memory_space<vmem>>, vector<1x8xf32>
      %480 = arith.index_cast %c4_i32 : i32 to index
      %c0_137 = arith.constant 0 : index
      %481 = vector.load %arg7[%480, %c0_137] : memref<8x1xf32, #tpu.memory_space<vmem>>, vector<1x1xf32>
      %cst_138 = arith.constant dense<0.000000e+00> : vector<8x1xf32>
      %482 = tpu.matmul %19, %439, %cst_138 {dimension_numbers = #tpu.dot_dimension_numbers<[1], [0], [0], [1], [0, 0, 1, 1], [], []>} : vector<8x8xf32>, vector<8x1xf32>, vector<8x1xf32> -> vector<8x1xf32>
      %483 = vector.broadcast %482 : vector<8x1xf32> to vector<8x8xf32>
      %484 = arith.subf %19, %483 : vector<8x8xf32>
      %485 = vector.broadcast %479 : vector<1x8xf32> to vector<8x8xf32>
      %486 = arith.subf %484, %485 : vector<8x8xf32>
      %487 = vector.broadcast %481 : vector<1x1xf32> to vector<8x8xf32>
      %488 = arith.addf %486, %487 : vector<8x8xf32>
      %489 = vector.broadcast %481 : vector<1x1xf32> to vector<1x8xf32>
      %490 = arith.addf %32, %489 : vector<1x8xf32>
      %cst_139 = arith.constant 2.000000e+00 : f32
      %491 = vector.broadcast %cst_139 : f32 to vector<1x8xf32>
      %492 = arith.mulf %491, %479 : vector<1x8xf32>
      %493 = arith.subf %490, %492 : vector<1x8xf32>
      %cst_140 = arith.constant 1.000000e-24 : f32
      %494 = vector.broadcast %cst_140 : f32 to vector<1x8xf32>
      %495 = arith.maximumf %493, %494 : vector<1x8xf32>
      %496 = math.rsqrt %495 : vector<1x8xf32>
      %497 = vector.broadcast %481 : vector<1x1xf32> to vector<8x1xf32>
      %498 = arith.addf %34, %497 : vector<8x1xf32>
      %cst_141 = arith.constant 2.000000e+00 : f32
      %499 = vector.broadcast %cst_141 : f32 to vector<8x1xf32>
      %500 = arith.mulf %499, %482 : vector<8x1xf32>
      %501 = arith.subf %498, %500 : vector<8x1xf32>
      %cst_142 = arith.constant 1.000000e-24 : f32
      %502 = vector.broadcast %cst_142 : f32 to vector<8x1xf32>
      %503 = arith.maximumf %501, %502 : vector<8x1xf32>
      %504 = math.rsqrt %503 : vector<8x1xf32>
      %505 = vector.broadcast %504 : vector<8x1xf32> to vector<8x8xf32>
      %506 = arith.mulf %488, %505 : vector<8x8xf32>
      %507 = vector.broadcast %496 : vector<1x8xf32> to vector<8x8xf32>
      %508 = arith.mulf %506, %507 : vector<8x8xf32>
      %cst_143 = arith.constant 0.000000e+00 : f32
      %509 = vector.broadcast %cst_143 : f32 to vector<8x8xf32>
      %510 = arith.select %444, %508, %509 : vector<8x8xi1>, vector<8x8xf32>
      %511 = arith.subf %510, %477 : vector<8x8xf32>
      %512 = math.absf %511 : vector<8x8xf32>
      %cst_144 = arith.constant 1.000000e+00 : f32
      %513 = vector.broadcast %cst_144 : f32 to vector<8x8xf32>
      %514 = arith.cmpf olt, %512, %513 : vector<8x8xf32>
      %cst_145 = arith.constant 5.000000e-01 : f32
      %515 = vector.broadcast %cst_145 : f32 to vector<8x8xf32>
      %516 = arith.mulf %515, %511 : vector<8x8xf32>
      %517 = arith.mulf %516, %511 : vector<8x8xf32>
      %cst_146 = arith.constant 5.000000e-01 : f32
      %518 = vector.broadcast %cst_146 : f32 to vector<8x8xf32>
      %519 = arith.subf %512, %518 : vector<8x8xf32>
      %520 = arith.select %514, %517, %519 : vector<8x8xi1>, vector<8x8xf32>
      %521 = arith.addf %435, %520 : vector<8x8xf32>
      %c5_i32 = arith.constant 5 : i32
      %522 = vector.broadcast %c5_i32 : i32 to vector<8x1xi32>
      %523 = arith.cmpi eq, %90, %522 : vector<8x1xi32>
      %524 = arith.extui %523 : vector<8x1xi1> to vector<8x1xi32>
      %525 = arith.sitofp %524 : vector<8x1xi32> to vector<8x1xf32>
      %526 = vector.broadcast %c5_i32 : i32 to vector<8x8xi32>
      %527 = arith.cmpi ne, %20, %526 : vector<8x8xi32>
      %528 = vector.broadcast %c5_i32 : i32 to vector<8x8xi32>
      %529 = arith.cmpi ne, %21, %528 : vector<8x8xi32>
      %530 = arith.andi %527, %529 : vector<8x8xi1>
      %531 = arith.index_cast %c5_i32 : i32 to index
      %c0_147 = arith.constant 0 : index
      %532 = vector.load %arg4[%531, %c0_147] : memref<8x8xf32, #tpu.memory_space<vmem>>, vector<1x8xf32>
      %533 = arith.index_cast %c5_i32 : i32 to index
      %c0_148 = arith.constant 0 : index
      %534 = vector.load %arg6[%533, %c0_148] : memref<8x1xf32, #tpu.memory_space<vmem>>, vector<1x1xf32>
      %cst_149 = arith.constant dense<0.000000e+00> : vector<8x1xf32>
      %535 = tpu.matmul %18, %525, %cst_149 {dimension_numbers = #tpu.dot_dimension_numbers<[1], [0], [0], [1], [0, 0, 1, 1], [], []>} : vector<8x8xf32>, vector<8x1xf32>, vector<8x1xf32> -> vector<8x1xf32>
      %536 = vector.broadcast %535 : vector<8x1xf32> to vector<8x8xf32>
      %537 = arith.subf %18, %536 : vector<8x8xf32>
      %538 = vector.broadcast %532 : vector<1x8xf32> to vector<8x8xf32>
      %539 = arith.subf %537, %538 : vector<8x8xf32>
      %540 = vector.broadcast %534 : vector<1x1xf32> to vector<8x8xf32>
      %541 = arith.addf %539, %540 : vector<8x8xf32>
      %542 = vector.broadcast %534 : vector<1x1xf32> to vector<1x8xf32>
      %543 = arith.addf %26, %542 : vector<1x8xf32>
      %cst_150 = arith.constant 2.000000e+00 : f32
      %544 = vector.broadcast %cst_150 : f32 to vector<1x8xf32>
      %545 = arith.mulf %544, %532 : vector<1x8xf32>
      %546 = arith.subf %543, %545 : vector<1x8xf32>
      %cst_151 = arith.constant 1.000000e-24 : f32
      %547 = vector.broadcast %cst_151 : f32 to vector<1x8xf32>
      %548 = arith.maximumf %546, %547 : vector<1x8xf32>
      %549 = math.rsqrt %548 : vector<1x8xf32>
      %550 = vector.broadcast %534 : vector<1x1xf32> to vector<8x1xf32>
      %551 = arith.addf %28, %550 : vector<8x1xf32>
      %cst_152 = arith.constant 2.000000e+00 : f32
      %552 = vector.broadcast %cst_152 : f32 to vector<8x1xf32>
      %553 = arith.mulf %552, %535 : vector<8x1xf32>
      %554 = arith.subf %551, %553 : vector<8x1xf32>
      %cst_153 = arith.constant 1.000000e-24 : f32
      %555 = vector.broadcast %cst_153 : f32 to vector<8x1xf32>
      %556 = arith.maximumf %554, %555 : vector<8x1xf32>
      %557 = math.rsqrt %556 : vector<8x1xf32>
      %558 = vector.broadcast %557 : vector<8x1xf32> to vector<8x8xf32>
      %559 = arith.mulf %541, %558 : vector<8x8xf32>
      %560 = vector.broadcast %549 : vector<1x8xf32> to vector<8x8xf32>
      %561 = arith.mulf %559, %560 : vector<8x8xf32>
      %cst_154 = arith.constant 0.000000e+00 : f32
      %562 = vector.broadcast %cst_154 : f32 to vector<8x8xf32>
      %563 = arith.select %530, %561, %562 : vector<8x8xi1>, vector<8x8xf32>
      %564 = arith.index_cast %c5_i32 : i32 to index
      %c0_155 = arith.constant 0 : index
      %565 = vector.load %arg5[%564, %c0_155] : memref<8x8xf32, #tpu.memory_space<vmem>>, vector<1x8xf32>
      %566 = arith.index_cast %c5_i32 : i32 to index
      %c0_156 = arith.constant 0 : index
      %567 = vector.load %arg7[%566, %c0_156] : memref<8x1xf32, #tpu.memory_space<vmem>>, vector<1x1xf32>
      %cst_157 = arith.constant dense<0.000000e+00> : vector<8x1xf32>
      %568 = tpu.matmul %19, %525, %cst_157 {dimension_numbers = #tpu.dot_dimension_numbers<[1], [0], [0], [1], [0, 0, 1, 1], [], []>} : vector<8x8xf32>, vector<8x1xf32>, vector<8x1xf32> -> vector<8x1xf32>
      %569 = vector.broadcast %568 : vector<8x1xf32> to vector<8x8xf32>
      %570 = arith.subf %19, %569 : vector<8x8xf32>
      %571 = vector.broadcast %565 : vector<1x8xf32> to vector<8x8xf32>
      %572 = arith.subf %570, %571 : vector<8x8xf32>
      %573 = vector.broadcast %567 : vector<1x1xf32> to vector<8x8xf32>
      %574 = arith.addf %572, %573 : vector<8x8xf32>
      %575 = vector.broadcast %567 : vector<1x1xf32> to vector<1x8xf32>
      %576 = arith.addf %32, %575 : vector<1x8xf32>
      %cst_158 = arith.constant 2.000000e+00 : f32
      %577 = vector.broadcast %cst_158 : f32 to vector<1x8xf32>
      %578 = arith.mulf %577, %565 : vector<1x8xf32>
      %579 = arith.subf %576, %578 : vector<1x8xf32>
      %cst_159 = arith.constant 1.000000e-24 : f32
      %580 = vector.broadcast %cst_159 : f32 to vector<1x8xf32>
      %581 = arith.maximumf %579, %580 : vector<1x8xf32>
      %582 = math.rsqrt %581 : vector<1x8xf32>
      %583 = vector.broadcast %567 : vector<1x1xf32> to vector<8x1xf32>
      %584 = arith.addf %34, %583 : vector<8x1xf32>
      %cst_160 = arith.constant 2.000000e+00 : f32
      %585 = vector.broadcast %cst_160 : f32 to vector<8x1xf32>
      %586 = arith.mulf %585, %568 : vector<8x1xf32>
      %587 = arith.subf %584, %586 : vector<8x1xf32>
      %cst_161 = arith.constant 1.000000e-24 : f32
      %588 = vector.broadcast %cst_161 : f32 to vector<8x1xf32>
      %589 = arith.maximumf %587, %588 : vector<8x1xf32>
      %590 = math.rsqrt %589 : vector<8x1xf32>
      %591 = vector.broadcast %590 : vector<8x1xf32> to vector<8x8xf32>
      %592 = arith.mulf %574, %591 : vector<8x8xf32>
      %593 = vector.broadcast %582 : vector<1x8xf32> to vector<8x8xf32>
      %594 = arith.mulf %592, %593 : vector<8x8xf32>
      %cst_162 = arith.constant 0.000000e+00 : f32
      %595 = vector.broadcast %cst_162 : f32 to vector<8x8xf32>
      %596 = arith.select %530, %594, %595 : vector<8x8xi1>, vector<8x8xf32>
      %597 = arith.subf %596, %563 : vector<8x8xf32>
      %598 = math.absf %597 : vector<8x8xf32>
      %cst_163 = arith.constant 1.000000e+00 : f32
      %599 = vector.broadcast %cst_163 : f32 to vector<8x8xf32>
      %600 = arith.cmpf olt, %598, %599 : vector<8x8xf32>
      %cst_164 = arith.constant 5.000000e-01 : f32
      %601 = vector.broadcast %cst_164 : f32 to vector<8x8xf32>
      %602 = arith.mulf %601, %597 : vector<8x8xf32>
      %603 = arith.mulf %602, %597 : vector<8x8xf32>
      %cst_165 = arith.constant 5.000000e-01 : f32
      %604 = vector.broadcast %cst_165 : f32 to vector<8x8xf32>
      %605 = arith.subf %598, %604 : vector<8x8xf32>
      %606 = arith.select %600, %603, %605 : vector<8x8xi1>, vector<8x8xf32>
      %607 = arith.addf %521, %606 : vector<8x8xf32>
      %c6_i32 = arith.constant 6 : i32
      %608 = vector.broadcast %c6_i32 : i32 to vector<8x1xi32>
      %609 = arith.cmpi eq, %90, %608 : vector<8x1xi32>
      %610 = arith.extui %609 : vector<8x1xi1> to vector<8x1xi32>
      %611 = arith.sitofp %610 : vector<8x1xi32> to vector<8x1xf32>
      %612 = vector.broadcast %c6_i32 : i32 to vector<8x8xi32>
      %613 = arith.cmpi ne, %20, %612 : vector<8x8xi32>
      %614 = vector.broadcast %c6_i32 : i32 to vector<8x8xi32>
      %615 = arith.cmpi ne, %21, %614 : vector<8x8xi32>
      %616 = arith.andi %613, %615 : vector<8x8xi1>
      %617 = arith.index_cast %c6_i32 : i32 to index
      %c0_166 = arith.constant 0 : index
      %618 = vector.load %arg4[%617, %c0_166] : memref<8x8xf32, #tpu.memory_space<vmem>>, vector<1x8xf32>
      %619 = arith.index_cast %c6_i32 : i32 to index
      %c0_167 = arith.constant 0 : index
      %620 = vector.load %arg6[%619, %c0_167] : memref<8x1xf32, #tpu.memory_space<vmem>>, vector<1x1xf32>
      %cst_168 = arith.constant dense<0.000000e+00> : vector<8x1xf32>
      %621 = tpu.matmul %18, %611, %cst_168 {dimension_numbers = #tpu.dot_dimension_numbers<[1], [0], [0], [1], [0, 0, 1, 1], [], []>} : vector<8x8xf32>, vector<8x1xf32>, vector<8x1xf32> -> vector<8x1xf32>
      %622 = vector.broadcast %621 : vector<8x1xf32> to vector<8x8xf32>
      %623 = arith.subf %18, %622 : vector<8x8xf32>
      %624 = vector.broadcast %618 : vector<1x8xf32> to vector<8x8xf32>
      %625 = arith.subf %623, %624 : vector<8x8xf32>
      %626 = vector.broadcast %620 : vector<1x1xf32> to vector<8x8xf32>
      %627 = arith.addf %625, %626 : vector<8x8xf32>
      %628 = vector.broadcast %620 : vector<1x1xf32> to vector<1x8xf32>
      %629 = arith.addf %26, %628 : vector<1x8xf32>
      %cst_169 = arith.constant 2.000000e+00 : f32
      %630 = vector.broadcast %cst_169 : f32 to vector<1x8xf32>
      %631 = arith.mulf %630, %618 : vector<1x8xf32>
      %632 = arith.subf %629, %631 : vector<1x8xf32>
      %cst_170 = arith.constant 1.000000e-24 : f32
      %633 = vector.broadcast %cst_170 : f32 to vector<1x8xf32>
      %634 = arith.maximumf %632, %633 : vector<1x8xf32>
      %635 = math.rsqrt %634 : vector<1x8xf32>
      %636 = vector.broadcast %620 : vector<1x1xf32> to vector<8x1xf32>
      %637 = arith.addf %28, %636 : vector<8x1xf32>
      %cst_171 = arith.constant 2.000000e+00 : f32
      %638 = vector.broadcast %cst_171 : f32 to vector<8x1xf32>
      %639 = arith.mulf %638, %621 : vector<8x1xf32>
      %640 = arith.subf %637, %639 : vector<8x1xf32>
      %cst_172 = arith.constant 1.000000e-24 : f32
      %641 = vector.broadcast %cst_172 : f32 to vector<8x1xf32>
      %642 = arith.maximumf %640, %641 : vector<8x1xf32>
      %643 = math.rsqrt %642 : vector<8x1xf32>
      %644 = vector.broadcast %643 : vector<8x1xf32> to vector<8x8xf32>
      %645 = arith.mulf %627, %644 : vector<8x8xf32>
      %646 = vector.broadcast %635 : vector<1x8xf32> to vector<8x8xf32>
      %647 = arith.mulf %645, %646 : vector<8x8xf32>
      %cst_173 = arith.constant 0.000000e+00 : f32
      %648 = vector.broadcast %cst_173 : f32 to vector<8x8xf32>
      %649 = arith.select %616, %647, %648 : vector<8x8xi1>, vector<8x8xf32>
      %650 = arith.index_cast %c6_i32 : i32 to index
      %c0_174 = arith.constant 0 : index
      %651 = vector.load %arg5[%650, %c0_174] : memref<8x8xf32, #tpu.memory_space<vmem>>, vector<1x8xf32>
      %652 = arith.index_cast %c6_i32 : i32 to index
      %c0_175 = arith.constant 0 : index
      %653 = vector.load %arg7[%652, %c0_175] : memref<8x1xf32, #tpu.memory_space<vmem>>, vector<1x1xf32>
      %cst_176 = arith.constant dense<0.000000e+00> : vector<8x1xf32>
      %654 = tpu.matmul %19, %611, %cst_176 {dimension_numbers = #tpu.dot_dimension_numbers<[1], [0], [0], [1], [0, 0, 1, 1], [], []>} : vector<8x8xf32>, vector<8x1xf32>, vector<8x1xf32> -> vector<8x1xf32>
      %655 = vector.broadcast %654 : vector<8x1xf32> to vector<8x8xf32>
      %656 = arith.subf %19, %655 : vector<8x8xf32>
      %657 = vector.broadcast %651 : vector<1x8xf32> to vector<8x8xf32>
      %658 = arith.subf %656, %657 : vector<8x8xf32>
      %659 = vector.broadcast %653 : vector<1x1xf32> to vector<8x8xf32>
      %660 = arith.addf %658, %659 : vector<8x8xf32>
      %661 = vector.broadcast %653 : vector<1x1xf32> to vector<1x8xf32>
      %662 = arith.addf %32, %661 : vector<1x8xf32>
      %cst_177 = arith.constant 2.000000e+00 : f32
      %663 = vector.broadcast %cst_177 : f32 to vector<1x8xf32>
      %664 = arith.mulf %663, %651 : vector<1x8xf32>
      %665 = arith.subf %662, %664 : vector<1x8xf32>
      %cst_178 = arith.constant 1.000000e-24 : f32
      %666 = vector.broadcast %cst_178 : f32 to vector<1x8xf32>
      %667 = arith.maximumf %665, %666 : vector<1x8xf32>
      %668 = math.rsqrt %667 : vector<1x8xf32>
      %669 = vector.broadcast %653 : vector<1x1xf32> to vector<8x1xf32>
      %670 = arith.addf %34, %669 : vector<8x1xf32>
      %cst_179 = arith.constant 2.000000e+00 : f32
      %671 = vector.broadcast %cst_179 : f32 to vector<8x1xf32>
      %672 = arith.mulf %671, %654 : vector<8x1xf32>
      %673 = arith.subf %670, %672 : vector<8x1xf32>
      %cst_180 = arith.constant 1.000000e-24 : f32
      %674 = vector.broadcast %cst_180 : f32 to vector<8x1xf32>
      %675 = arith.maximumf %673, %674 : vector<8x1xf32>
      %676 = math.rsqrt %675 : vector<8x1xf32>
      %677 = vector.broadcast %676 : vector<8x1xf32> to vector<8x8xf32>
      %678 = arith.mulf %660, %677 : vector<8x8xf32>
      %679 = vector.broadcast %668 : vector<1x8xf32> to vector<8x8xf32>
      %680 = arith.mulf %678, %679 : vector<8x8xf32>
      %cst_181 = arith.constant 0.000000e+00 : f32
      %681 = vector.broadcast %cst_181 : f32 to vector<8x8xf32>
      %682 = arith.select %616, %680, %681 : vector<8x8xi1>, vector<8x8xf32>
      %683 = arith.subf %682, %649 : vector<8x8xf32>
      %684 = math.absf %683 : vector<8x8xf32>
      %cst_182 = arith.constant 1.000000e+00 : f32
      %685 = vector.broadcast %cst_182 : f32 to vector<8x8xf32>
      %686 = arith.cmpf olt, %684, %685 : vector<8x8xf32>
      %cst_183 = arith.constant 5.000000e-01 : f32
      %687 = vector.broadcast %cst_183 : f32 to vector<8x8xf32>
      %688 = arith.mulf %687, %683 : vector<8x8xf32>
      %689 = arith.mulf %688, %683 : vector<8x8xf32>
      %cst_184 = arith.constant 5.000000e-01 : f32
      %690 = vector.broadcast %cst_184 : f32 to vector<8x8xf32>
      %691 = arith.subf %684, %690 : vector<8x8xf32>
      %692 = arith.select %686, %689, %691 : vector<8x8xi1>, vector<8x8xf32>
      %693 = arith.addf %607, %692 : vector<8x8xf32>
      %c7_i32 = arith.constant 7 : i32
      %694 = vector.broadcast %c7_i32 : i32 to vector<8x1xi32>
      %695 = arith.cmpi eq, %90, %694 : vector<8x1xi32>
      %696 = arith.extui %695 : vector<8x1xi1> to vector<8x1xi32>
      %697 = arith.sitofp %696 : vector<8x1xi32> to vector<8x1xf32>
      %698 = vector.broadcast %c7_i32 : i32 to vector<8x8xi32>
      %699 = arith.cmpi ne, %20, %698 : vector<8x8xi32>
      %700 = vector.broadcast %c7_i32 : i32 to vector<8x8xi32>
      %701 = arith.cmpi ne, %21, %700 : vector<8x8xi32>
      %702 = arith.andi %699, %701 : vector<8x8xi1>
      %703 = arith.index_cast %c7_i32 : i32 to index
      %c0_185 = arith.constant 0 : index
      %704 = vector.load %arg4[%703, %c0_185] : memref<8x8xf32, #tpu.memory_space<vmem>>, vector<1x8xf32>
      %705 = arith.index_cast %c7_i32 : i32 to index
      %c0_186 = arith.constant 0 : index
      %706 = vector.load %arg6[%705, %c0_186] : memref<8x1xf32, #tpu.memory_space<vmem>>, vector<1x1xf32>
      %cst_187 = arith.constant dense<0.000000e+00> : vector<8x1xf32>
      %707 = tpu.matmul %18, %697, %cst_187 {dimension_numbers = #tpu.dot_dimension_numbers<[1], [0], [0], [1], [0, 0, 1, 1], [], []>} : vector<8x8xf32>, vector<8x1xf32>, vector<8x1xf32> -> vector<8x1xf32>
      %708 = vector.broadcast %707 : vector<8x1xf32> to vector<8x8xf32>
      %709 = arith.subf %18, %708 : vector<8x8xf32>
      %710 = vector.broadcast %704 : vector<1x8xf32> to vector<8x8xf32>
      %711 = arith.subf %709, %710 : vector<8x8xf32>
      %712 = vector.broadcast %706 : vector<1x1xf32> to vector<8x8xf32>
      %713 = arith.addf %711, %712 : vector<8x8xf32>
      %714 = vector.broadcast %706 : vector<1x1xf32> to vector<1x8xf32>
      %715 = arith.addf %26, %714 : vector<1x8xf32>
      %cst_188 = arith.constant 2.000000e+00 : f32
      %716 = vector.broadcast %cst_188 : f32 to vector<1x8xf32>
      %717 = arith.mulf %716, %704 : vector<1x8xf32>
      %718 = arith.subf %715, %717 : vector<1x8xf32>
      %cst_189 = arith.constant 1.000000e-24 : f32
      %719 = vector.broadcast %cst_189 : f32 to vector<1x8xf32>
      %720 = arith.maximumf %718, %719 : vector<1x8xf32>
      %721 = math.rsqrt %720 : vector<1x8xf32>
      %722 = vector.broadcast %706 : vector<1x1xf32> to vector<8x1xf32>
      %723 = arith.addf %28, %722 : vector<8x1xf32>
      %cst_190 = arith.constant 2.000000e+00 : f32
      %724 = vector.broadcast %cst_190 : f32 to vector<8x1xf32>
      %725 = arith.mulf %724, %707 : vector<8x1xf32>
      %726 = arith.subf %723, %725 : vector<8x1xf32>
      %cst_191 = arith.constant 1.000000e-24 : f32
      %727 = vector.broadcast %cst_191 : f32 to vector<8x1xf32>
      %728 = arith.maximumf %726, %727 : vector<8x1xf32>
      %729 = math.rsqrt %728 : vector<8x1xf32>
      %730 = vector.broadcast %729 : vector<8x1xf32> to vector<8x8xf32>
      %731 = arith.mulf %713, %730 : vector<8x8xf32>
      %732 = vector.broadcast %721 : vector<1x8xf32> to vector<8x8xf32>
      %733 = arith.mulf %731, %732 : vector<8x8xf32>
      %cst_192 = arith.constant 0.000000e+00 : f32
      %734 = vector.broadcast %cst_192 : f32 to vector<8x8xf32>
      %735 = arith.select %702, %733, %734 : vector<8x8xi1>, vector<8x8xf32>
      %736 = arith.index_cast %c7_i32 : i32 to index
      %c0_193 = arith.constant 0 : index
      %737 = vector.load %arg5[%736, %c0_193] : memref<8x8xf32, #tpu.memory_space<vmem>>, vector<1x8xf32>
      %738 = arith.index_cast %c7_i32 : i32 to index
      %c0_194 = arith.constant 0 : index
      %739 = vector.load %arg7[%738, %c0_194] : memref<8x1xf32, #tpu.memory_space<vmem>>, vector<1x1xf32>
      %cst_195 = arith.constant dense<0.000000e+00> : vector<8x1xf32>
      %740 = tpu.matmul %19, %697, %cst_195 {dimension_numbers = #tpu.dot_dimension_numbers<[1], [0], [0], [1], [0, 0, 1, 1], [], []>} : vector<8x8xf32>, vector<8x1xf32>, vector<8x1xf32> -> vector<8x1xf32>
      %741 = vector.broadcast %740 : vector<8x1xf32> to vector<8x8xf32>
      %742 = arith.subf %19, %741 : vector<8x8xf32>
      %743 = vector.broadcast %737 : vector<1x8xf32> to vector<8x8xf32>
      %744 = arith.subf %742, %743 : vector<8x8xf32>
      %745 = vector.broadcast %739 : vector<1x1xf32> to vector<8x8xf32>
      %746 = arith.addf %744, %745 : vector<8x8xf32>
      %747 = vector.broadcast %739 : vector<1x1xf32> to vector<1x8xf32>
      %748 = arith.addf %32, %747 : vector<1x8xf32>
      %cst_196 = arith.constant 2.000000e+00 : f32
      %749 = vector.broadcast %cst_196 : f32 to vector<1x8xf32>
      %750 = arith.mulf %749, %737 : vector<1x8xf32>
      %751 = arith.subf %748, %750 : vector<1x8xf32>
      %cst_197 = arith.constant 1.000000e-24 : f32
      %752 = vector.broadcast %cst_197 : f32 to vector<1x8xf32>
      %753 = arith.maximumf %751, %752 : vector<1x8xf32>
      %754 = math.rsqrt %753 : vector<1x8xf32>
      %755 = vector.broadcast %739 : vector<1x1xf32> to vector<8x1xf32>
      %756 = arith.addf %34, %755 : vector<8x1xf32>
      %cst_198 = arith.constant 2.000000e+00 : f32
      %757 = vector.broadcast %cst_198 : f32 to vector<8x1xf32>
      %758 = arith.mulf %757, %740 : vector<8x1xf32>
      %759 = arith.subf %756, %758 : vector<8x1xf32>
      %cst_199 = arith.constant 1.000000e-24 : f32
      %760 = vector.broadcast %cst_199 : f32 to vector<8x1xf32>
      %761 = arith.maximumf %759, %760 : vector<8x1xf32>
      %762 = math.rsqrt %761 : vector<8x1xf32>
      %763 = vector.broadcast %762 : vector<8x1xf32> to vector<8x8xf32>
      %764 = arith.mulf %746, %763 : vector<8x8xf32>
      %765 = vector.broadcast %754 : vector<1x8xf32> to vector<8x8xf32>
      %766 = arith.mulf %764, %765 : vector<8x8xf32>
      %cst_200 = arith.constant 0.000000e+00 : f32
      %767 = vector.broadcast %cst_200 : f32 to vector<8x8xf32>
      %768 = arith.select %702, %766, %767 : vector<8x8xi1>, vector<8x8xf32>
      %769 = arith.subf %768, %735 : vector<8x8xf32>
      %770 = math.absf %769 : vector<8x8xf32>
      %cst_201 = arith.constant 1.000000e+00 : f32
      %771 = vector.broadcast %cst_201 : f32 to vector<8x8xf32>
      %772 = arith.cmpf olt, %770, %771 : vector<8x8xf32>
      %cst_202 = arith.constant 5.000000e-01 : f32
      %773 = vector.broadcast %cst_202 : f32 to vector<8x8xf32>
      %774 = arith.mulf %773, %769 : vector<8x8xf32>
      %775 = arith.mulf %774, %769 : vector<8x8xf32>
      %cst_203 = arith.constant 5.000000e-01 : f32
      %776 = vector.broadcast %cst_203 : f32 to vector<8x8xf32>
      %777 = arith.subf %770, %776 : vector<8x8xf32>
      %778 = arith.select %772, %775, %777 : vector<8x8xi1>, vector<8x8xf32>
      %779 = arith.addf %693, %778 : vector<8x8xf32>
      %c8_i32 = arith.constant 8 : i32
      %780 = vector.shape_cast %779 : vector<8x8xf32> to vector<1x8x8xf32>
      %cst_204 = arith.constant dense<0.000000e+00> : vector<1xf32>
      %781 = vector.multi_reduction <add>, %780, %cst_204 [1, 2] : vector<1x8x8xf32> to vector<1xf32>
      %782 = vector.shape_cast %781 : vector<1xf32> to vector<1x1x1xf32>
      %783 = vector.extract %782[0, 0, 0] : f32 from vector<1x1x1xf32>
      %cst_205 = arith.constant 0.001953125 : f32
      %784 = arith.mulf %783, %cst_205 : f32
      %cst_206 = arith.constant 5.000000e-01 : f32
      %785 = arith.mulf %cst_206, %784 : f32
      %cst_207 = arith.constant 5.000000e-01 : f32
      %786 = arith.mulf %cst_207, %89 : f32
      %787 = arith.addf %785, %786 : f32
      %c0_208 = arith.constant 0 : index
      %c0_209 = arith.constant 0 : index
      %788 = memref.load %arg3[%c0_208, %c0_209] : memref<1x1xf32, #tpu.memory_space<smem>>
      memref.store %787, %arg3[%c0_208, %c0_209] : memref<1x1xf32, #tpu.memory_space<smem>>
    } else {
    }
    return
  }
  func.func @transform_0(%arg0: i32) -> (i32, i32) {
    %c0_i32 = arith.constant 0 : i32
    %c0_i32_0 = arith.constant 0 : i32
    return %c0_i32, %arg0 : i32, i32
  }
  func.func @transform_1(%arg0: i32) -> (i32, i32) {
    %c0_i32 = arith.constant 0 : i32
    %c0_i32_0 = arith.constant 0 : i32
    return %c0_i32, %arg0 : i32, i32
  }
  func.func @transform_2(%arg0: i32) -> (i32, i32) {
    %c0_i32 = arith.constant 0 : i32
    %c0_i32_0 = arith.constant 0 : i32
    %c0_i32_1 = arith.constant 0 : i32
    return %c0_i32, %c0_i32_0 : i32, i32
  }
}

</mosaic_0001>

<bundles_post_ra>
// kernel: tpu_custom_call.1
= control target key start
LH: loop header
LB: loop body
LE: loop exit
PB: predicated region body
PF: predicated region fallthrough
CT: control target
= control target key end

     0   :  { %7 = vsyncpa [#allocation7], 0  ;;  %s2939_s0 = inlined_call_operand.hbm [shape: f32[8,32], index: 0, kind: input, shape index: {}]   ;;  %s2940_s1 = inlined_call_operand.hbm [shape: f32[8,32], index: 1, kind: input, shape index: {}]   ;;  %s2941_s2 = inlined_call_operand.hbm [shape: f32[1,1], index: 2, kind: output, shape index: {}]  }
   0x1   :  { %8 = vsyncpa [#allocation10], 0 }
   0x2   :  { %9 = vsyncpa [#allocation8], 0  ;;  %s15_s11 = sshll.u32 %s2939_s0, 4  ;;  %s1905_s12 = smov [#allocation6]   ;;  %s16_s11 = int_to_ptr.hbm [resolvable:$true] %s15_s11 }
   0x3   :  { %s17_s13 = sshll.u32 %s1905_s12, 4  ;;  %s26_s16 = sshll.u32 %s2940_s1, 4  ;;  %s18_s13 = int_to_ptr.vmem [resolvable:$true] %s17_s13  ;;  %s27_s16 = int_to_ptr.hbm [resolvable:$true] %s26_s16 }
   0x4   :  { %20 = dma.hbm_to_vmem [thread:$0]  %s16_s11, 128, %s18_s13, [#allocation7]  }
   0x5   :  { %s1906_s17 = smov [#allocation9]  }
   0x6   :  { %s28_s18 = sshll.u32 %s1906_s17, 4  ;;  %s29_s18 = int_to_ptr.vmem [resolvable:$true] %s28_s18 }
   0x7   :  { %31 = dma.hbm_to_vmem [thread:$0]  %s27_s16, 128, %s29_s18, [#allocation10]  }
   0x8   :  { %1899 = dma.done.wait [#allocation7], 128  }
   0x9   :  { %1900 = vsyncadd [#allocation7], 4294967168 }
   0xa   :  { %1901 = dma.done.wait [#allocation10], 128  }
   0xb   :  { %1902 = vsyncadd [#allocation10], 4294967168  ;;  %vm44_vm0 = vcmask 64512   ;;  %v1907_v0 = vmov 0.0   ;;  %vm49_vm1 = vcmask 261120   ;;  %v48_v1 = vld [vmem:[#allocation6] sm:$0xff]  ;;  %v108_v3 = vlaneseq }
   0xc   :  { %45 = vst.msk [vmem:[#allocation2] sm:$0xff] %vm44_vm0, %v1907_v0  ;;  %v77_v2 = vld [vmem:[#allocation9] sm:$0xff]  ;;  %1627 = vmatpush.xpose.msk.msra.mxu0 %vm49_vm1, %v48_v1  ;;  %v1908_v5 = vmov 1.0   ;;  %v1909_v19 = vmov 0   ;;  %vm133_vm11 = vcmask 7168   ;;  %s1615_s18 = sshll.u32 %s2941_s2, 4  ;;  %s1616_s18 = int_to_ptr.hbm [resolvable:$true] %s1615_s18 }
   0xd   :  { %46 = vst.msk [vmem:[#allocation3] sm:$0xff] %vm44_vm0, %v1907_v0  ;;  %1629 = vmatpush.xpose.msk.msra.mxu1 %vm49_vm1, %v77_v2  ;;  %v1934_v4 = vshrl.u32 %v108_v3, 7  ;;  %v1942_v12 = vand.u32 127, %v108_v3  ;;  %1727 = vset.pattern.permute.xlu0 %v1909_v19 }
   0xe   :  { %1726 = vset.pattern.permute.xlu2 %v1909_v19  ;;  %1728 = vset.pattern.permute.xlu1 %v1909_v19 }
   0xf   :  { %1628 = vmatmul.msk.f32.vlgmr.msra.gmra.mxu0 %vm49_vm1, %v48_v1  ;;  %2947 = vst [vmem:[#allocation15_spill] sm:$0xff] %v1934_v4  ;;  %vm244_vm2 = vcmp.eq.s32.totalorder %v1934_v4, 0  ;;  %vm586_vm3 = vcmp.eq.s32.totalorder %v1934_v4, 2  ;;  %vm418_vm4 = vcmp.eq.s32.totalorder %v1934_v4, 1  ;;  %vm922_vm5 = vcmp.eq.s32.totalorder %v1934_v4, 4 }
  0x10   :  { %1630 = vmatmul.msk.f32.vlgmr.msra.gmra.mxu1 %vm49_vm1, %v77_v2  ;;  %1633 = vmatpush.msk.msra.mxu2 %vm244_vm2, %v1908_v5  ;;  %2948 = vst [vmem:[#allocation16_spill] sm:$0xff] %v1942_v12  ;;  %vm112_vm6 = vcmp.eq.s32.totalorder %v1934_v4, %v1942_v12  ;;  %vm754_vm7 = vcmp.eq.s32.totalorder %v1934_v4, 3  ;;  %vm1258_vm8 = vcmp.eq.s32.totalorder %v1934_v4, 6  ;;  %vm1090_vm9 = vcmp.eq.s32.totalorder %v1934_v4, 5 }
  0x11   :  { %1635 = vmatpush.msk.msra.mxu3 %vm244_vm2, %v1908_v5  ;;  %1645 = vmatpush.msk.msrb.mxu0 %vm586_vm3, %v1908_v5  ;;  %vm1426_vm10 = vcmp.eq.s32.totalorder %v1934_v4, 7 }
  0x12   :  { %1647 = vmatpush.msk.msrb.mxu1 %vm586_vm3, %v1908_v5  ;;  %1639 = vmatpush.msk.msrb.mxu2 %vm418_vm4, %v1908_v5 }
  0x13   :  { %1641 = vmatpush.msk.msrb.mxu3 %vm418_vm4, %v1908_v5  ;;  %1657 = vmatpush.msk.msra.mxu0 %vm922_vm5, %v1908_v5  ;;  %v47_v6 = vld [vmem:[#allocation2] sm:$0xff] }
  0x14   :  { %1659 = vmatpush.msk.msra.mxu1 %vm922_vm5, %v1908_v5  ;;  %v76_v7 = vld [vmem:[#allocation3] sm:$0xff] }
  0x8c   :  { %v70_v8 = vpop.f32.mrf.mxu0 }
  0x8d   :  { %v98_v9 = vpop.f32.mrf.mxu1  ;;  %v73_v10 = vadd.f32 %v70_v8, %v47_v6 }
  0x8e   :  { %v101_v11 = vadd.f32 %v98_v9, %v76_v7 }
  0x8f   :  { %75 = vst.msk [vmem:[#allocation2] sm:$0xff] %vm44_vm0, %v73_v10 }
  0x90   :  { %102 = vst.msk [vmem:[#allocation3] sm:$0xff] %vm44_vm0, %v101_v11 }
  0x96   :  { %v106_v13 = vld [vmem:[#allocation2] sm:$0xff] }
  0x97   :  { %v1947_v14 = vld [vmem:[#allocation3] sm:$0xff]  ;;  %1634 = vmatmul.msk.f32.vlgmr.msra.gmra.mxu2 %vm44_vm0, %v106_v13  ;;  %1646 = vmatmul.msk.f32.vlgmr.msrb.gmra.mxu0 %vm44_vm0, %v106_v13  ;;  %v113_v15 = vsel %vm112_vm6, %v106_v13, 0.0  ;;  %v137_v32 = vmul.f32 2.0, %v106_v13 }
  0x98   :  { %1636 = vmatmul.msk.f32.vlgmr.msra.gmra.mxu3 %vm44_vm0, %v1947_v14  ;;  %1648 = vmatmul.msk.f32.vlgmr.msrb.gmra.mxu1 %vm44_vm0, %v1947_v14  ;;  %v114_v16 = vsel %vm44_vm0, %v113_v15, 0.0  ;;  %v123_v17 = vsel %vm112_vm6, %v1947_v14, 0.0  ;;  %v182_v43 = vmul.f32 2.0, %v1947_v14 }
  0x99   :  { %121 = vadd.xlane.f32.xlu0 %v114_v16  ;;  %1651 = vmatpush.msk.msra.mxu2 %vm754_vm7, %v1908_v5  ;;  %v124_v18 = vsel %vm44_vm0, %v123_v17, 0.0  ;;  %v115_v20 = vrot.slane %v114_v16, 4 }
  0x9a   :  { %1653 = vmatpush.msk.msra.mxu3 %vm754_vm7, %v1908_v5  ;;  %1669 = vmatpush.msk.msrb.mxu0 %vm1258_vm8, %v1908_v5  ;;  %v125_v23 = vrot.slane %v124_v18, 4 }
  0x9b   :  { %1671 = vmatpush.msk.msrb.mxu1 %vm1258_vm8, %v1908_v5  ;;  %v116_v21 = vadd.f32 %v115_v20, %v114_v16 }
  0x9c   :  { %v126_v25 = vadd.f32 %v125_v23, %v124_v18 }
  0x9d   :  { %v117_v22 = vrot.slane %v116_v21, 2 }
  0x9e   :  { %v127_v27 = vrot.slane %v126_v25, 2 }
  0x9f   :  { %1640 = vmatmul.msk.f32.vlgmr.msrb.gmra.mxu2 %vm44_vm0, %v106_v13  ;;  %1658 = vmatmul.msk.f32.vlgmr.msra.gmra.mxu0 %vm44_vm0, %v106_v13  ;;  %v118_v24 = vadd.f32 %v117_v22, %v116_v21 }
  0xa0   :  { %1642 = vmatmul.msk.f32.vlgmr.msrb.gmra.mxu3 %vm44_vm0, %v1947_v14  ;;  %1660 = vmatmul.msk.f32.vlgmr.msra.gmra.mxu1 %vm44_vm0, %v1947_v14  ;;  %v128_v29 = vadd.f32 %v127_v27, %v126_v25 }
  0xa1   :  { %131 = vadd.xlane.f32.xlu0 %v124_v18  ;;  %1663 = vmatpush.msk.msrb.mxu2 %vm1090_vm9, %v1908_v5  ;;  %v119_v26 = vrot.slane %v118_v24, 1 }
  0xa2   :  { %1665 = vmatpush.msk.msrb.mxu3 %vm1090_vm9, %v1908_v5  ;;  %v129_v33 = vrot.slane %v128_v29, 1 }
  0xa3   :  { %v1985_v28 = vadd.f32 %v119_v26, %v118_v24 }
  0xa4   :  { %v1993_v36 = vadd.f32 %v129_v33, %v128_v29 }
  0xa7   :  { %1652 = vmatmul.msk.f32.vlgmr.msra.gmra.mxu2 %vm44_vm0, %v106_v13  ;;  %1670 = vmatmul.msk.f32.vlgmr.msrb.gmra.mxu0 %vm44_vm0, %v106_v13 }
  0xa8   :  { %1654 = vmatmul.msk.f32.vlgmr.msra.gmra.mxu3 %vm44_vm0, %v1947_v14  ;;  %1672 = vmatmul.msk.f32.vlgmr.msrb.gmra.mxu1 %vm44_vm0, %v1947_v14 }
  0xa9   :  { %1675 = vmatpush.msk.msra.mxu2 %vm1426_vm10, %v1908_v5  ;;  %1677 = vmatpush.msk.msra.mxu3 %vm1426_vm10, %v1908_v5 }
  0xaf   :  { %1664 = vmatmul.msk.f32.vlgmr.msrb.gmra.mxu2 %vm44_vm0, %v106_v13 }
  0xb0   :  { %1666 = vmatmul.msk.f32.vlgmr.msrb.gmra.mxu3 %vm44_vm0, %v1947_v14 }
  0xb7   :  { %1676 = vmatmul.msk.f32.vlgmr.msra.gmra.mxu2 %vm44_vm0, %v106_v13 }
  0xb8   :  { %1678 = vmatmul.msk.f32.vlgmr.msra.gmra.mxu3 %vm44_vm0, %v1947_v14 }
 0x10c   :  { %v1987_v30 = vpop.xlane.xlu0 %121 }
 0x10d   :  { %134 = vst.msk [vmem:[#allocation4] sm:$0xff] %vm133_vm11, %v1987_v30  ;;  %v136_v31 = vadd.f32 %v1987_v30, %v1985_v28 }
 0x10f   :  { %v138_v34 = vsub.f32 %v136_v31, %v137_v32 }
 0x111   :  { %v139_v35 = vmax.f32 %v138_v34, 1e-10 }
 0x113   :  { %1761 = vrsqrt.f32 %v139_v35  ;;  %vm147_vm12 = vcmp.eq.f32.partialorder %v139_v35, inf  ;;  %v150_v13 = vand.u32 2147483648, %v139_v35  ;;  %vm149_vm13 = vcmp.eq.f32.partialorder %v139_v35, 0.0 }
 0x114   :  { %v1995_v37 = vpop.f32.mrf.mxu0  ;;  %v1729_v38 = vld [vmem:[#allocation4 + $0x2] ss:$0 sm:$0xff]  ;;  %v1997_v39 = vpop.xlane.xlu0 %131  ;;  %v251_v40 = vld [vmem:[#allocation4] sm:$0x1]  ;;  %v929_v55 = vld [vmem:[#allocation4 + $0x4] sm:$0x1] }
 0x115   :  { %v647_v41 = vmul.f32 2.0, %v1995_v37  ;;  %135 = vst.msk [vmem:[#allocation5] sm:$0xff] %vm133_vm11, %v1997_v39  ;;  %v181_v42 = vadd.f32 %v1997_v39, %v1993_v36  ;;  %289 = vperm.xlu0 %1727, %v251_v40   ;;  %v646_v44 = vadd.f32 %v1729_v38, %v1987_v30  ;;  %v1730_v45 = vld [vmem:[#allocation4] ss:$0 sm:$0xff]  ;;  %v2021_v61 = vpop.f32.mrf.mxu1  ;;  %v1737_v2 = vld [vmem:[#allocation4 + $0x1] ss:$0 sm:$0xff] }
 0x116   :  { %v2011_v53 = vadd.f32 %v1730_v45, %v1987_v30  ;;  %v724_v0 = vmul.f32 2.0, %v2021_v61  ;;  %v478_v15 = vadd.f32 %v1737_v2, %v1987_v30  ;;  %v1433_v34 = vld [vmem:[#allocation4 + $0x7] sm:$0x1] }
 0x117   :  { %v183_v46 = vsub.f32 %v181_v42, %v182_v43  ;;  %v648_v47 = vsub.f32 %v646_v44, %v647_v41 }
 0x119   :  { %v1762_v48 = vpop.eup %1761  ;;  %v2006_v49 = vmax.f32 %v183_v46, 1e-10  ;;  %v2008_v52 = vmax.f32 %v648_v47, 1e-24 }
 0x11a   :  { %v272_v50 = vpop.f32.mrf.mxu2  ;;  %v141_v51 = vmul.f32 %v1762_v48, %v139_v35 }
 0x11b   :  { %v2013_v54 = vmul.f32 2.0, %v272_v50  ;;  %277 = vperm.xlu2 %1726, %v272_v50   ;;  %1763 = vrsqrt.f32 %v2006_v49  ;;  %v2018_v58 = vpop.f32.mrf.mxu3  ;;  %vm192_vm14 = vcmp.eq.f32.partialorder %v2006_v49, inf  ;;  %v195_v40 = vand.u32 2147483648, %v2006_v49  ;;  %v1743_v50 = vld [vmem:[#allocation4 + $0x5] ss:$0 sm:$0xff] }
 0x11c   :  { %v142_v56 = vmul.f32 %v1762_v48, %v141_v51  ;;  %1765 = vrsqrt.f32 %v2008_v52  ;;  %v1736_v60 = vld [vmem:[#allocation5 + $0x2] ss:$0 sm:$0xff]  ;;  %v1174_v8 = vld [vmem:[#allocation5 + $0x5] sm:$0x1]  ;;  %v1739_v26 = vld [vmem:[#allocation5 + $0x1] ss:$0 sm:$0xff]  ;;  %vm656_vm2 = vweird.f32 %v2008_v52 }
 0x11d   :  { %v309_v57 = vsub.f32 %v2011_v53, %v2013_v54  ;;  %964 = vperm.xlu0 %1727, %v929_v55   ;;  %v723_v1 = vadd.f32 %v1736_v60, %v1997_v39  ;;  %v2044_v29 = vld [vmem:[#allocation5] sm:$0x1]  ;;  %v555_v41 = vadd.f32 %v1739_v26, %v1997_v39  ;;  %vm194_vm15 = vcmp.eq.f32.partialorder %v2006_v49, 0.0 }
 0x11e   :  { %v143_v59 = vmul.f32 0.5, %v142_v56 }
 0x11f   :  { %v725_v14 = vsub.f32 %v723_v1, %v724_v0 }
 0x120   :  { %v144_v62 = vsub.f32 1.5, %v143_v59 }
 0x121   :  { %v1764_v63 = vpop.eup %1763  ;;  %v2030_v19 = vmax.f32 %v725_v14, 1e-24 }
 0x122   :  { %v443_v3 = vpop.f32.mrf.mxu2  ;;  %v145_v5 = vmul.f32 %v1762_v48, %v144_v62  ;;  %v186_v6 = vmul.f32 %v1764_v63, %v2006_v49  ;;  %v2027_v11 = vpop.eup %1765 }
 0x123   :  { %v479_v7 = vmul.f32 2.0, %v443_v3  ;;  %357 = vperm.xlu2 %1726, %v2018_v58   ;;  %v651_v21 = vmul.f32 %v2027_v11, %v2008_v52  ;;  %v520_v22 = vpop.f32.mrf.mxu3  ;;  %1767 = vrsqrt.f32 %v2030_v19  ;;  %vm657_vm1 = vweird.f32 %v2027_v11  ;;  %v1731_v52 = vld [vmem:[#allocation4 + $0x4] ss:$0 sm:$0xff] }
 0x124   :  { %v146_v9 = vmul.f32 %v145_v5, %v139_v35  ;;  %v187_v10 = vmul.f32 %v1764_v63, %v186_v6  ;;  %v556_v32 = vmul.f32 2.0, %v520_v22  ;;  %v1733_v6 = vld [vmem:[#allocation5 + $0x3] ss:$0 sm:$0xff]  ;;  %vm658_vm3 = vmor %vm656_vm2, %vm657_vm1  ;;  %vm733_vm5 = vweird.f32 %v2030_v19 }
 0x125   :  { %1209 = vperm.xlu0 %1727, %v1174_v8   ;;  %v480_v20 = vsub.f32 %v478_v15, %v479_v7  ;;  %v652_v38 = vmul.f32 %v2027_v11, %v651_v21  ;;  %v891_v14 = vadd.f32 %v1733_v6, %v1997_v39  ;;  %v982_v26 = vadd.f32 %v1731_v52, %v1987_v30 }
 0x126   :  { %v148_v16 = vsel %vm147_vm12, %v139_v35, %v146_v9  ;;  %v188_v17 = vmul.f32 0.5, %v187_v10  ;;  %v557_v45 = vsub.f32 %v555_v41, %v556_v32 }
 0x127   :  { %v151_v18 = vsel %vm149_vm13, %v150_v13, %v148_v16  ;;  %v2047_v33 = vmax.f32 %v480_v20, 1e-24  ;;  %v653_v47 = vmul.f32 0.5, %v652_v38  ;;  %v2084_v16 = vpop.f32.mrf.mxu0 }
 0x128   :  { %v2037_v23 = vsel %vm112_vm6, 0.0, %v151_v18  ;;  %v189_v24 = vsub.f32 1.5, %v188_v17  ;;  %v2070_v56 = vmax.f32 %v557_v45, 1e-24  ;;  %v983_v21 = vmul.f32 2.0, %v2084_v16 }
 0x129   :  { %v153_v25 = vsel %vm44_vm0, %v2037_v23, 0.0  ;;  %v1768_v43 = vpop.eup %1767  ;;  %1769 = vrsqrt.f32 %v2047_v33  ;;  %v654_v60 = vsub.f32 1.5, %v653_v47  ;;  %vm488_vm8 = vweird.f32 %v2047_v33  ;;  %v2107_v45 = vld [vmem:[#allocation4 + $0x3] sm:$0x1] }
 0x12a   :  { %v2042_v27 = vpop.f32.mrf.mxu2  ;;  %154 = vadd.xlane.f32.xlu1 %v153_v25  ;;  %v190_v31 = vmul.f32 %v1764_v63, %v189_v24  ;;  %v728_v48 = vmul.f32 %v1768_v43, %v2030_v19  ;;  %v2073_v63 = vadd.f32 %v1743_v50, %v1987_v30  ;;  %1771 = vrsqrt.f32 %v2070_v56  ;;  %v2094_v19 = vld [vmem:[#allocation4 + $0x1] sm:$0x1] }
 0x12b   :  { %369 = vperm.xlu2 %1726, %v2044_v29   ;;  %v856_v59 = vpop.f32.mrf.mxu3  ;;  %v655_v2 = vmul.f32 %v2027_v11, %v654_v60  ;;  %vm734_vm4 = vweird.f32 %v1768_v43  ;;  %vm565_vm11 = vweird.f32 %v2070_v56 }
 0x12c   :  { %v191_v35 = vmul.f32 %v190_v31, %v2006_v49  ;;  %v729_v62 = vmul.f32 %v1768_v43, %v728_v48  ;;  %v892_v7 = vmul.f32 2.0, %v856_v59  ;;  %v984_v31 = vsub.f32 %v982_v26, %v983_v21 }
 0x12d   :  { %1468 = vperm.xlu0 %1727, %v1433_v34   ;;  %v659_v8 = vsel %vm658_vm3, %v2027_v11, %v655_v2  ;;  %v388_v26 = vmul.f32 2.0, %v2018_v58 }
 0x12e   :  { %v193_v42 = vsel %vm192_vm14, %v2006_v49, %v191_v35  ;;  %v893_v15 = vsub.f32 %v891_v14, %v892_v7  ;;  %v2097_v35 = vmax.f32 %v984_v31, 1e-24 }
 0x12f   :  { %v196_v44 = vsel %vm194_vm15, %v195_v40, %v193_v42  ;;  %v1770_v0 = vpop.eup %1769  ;;  %v2104_v42 = vpop.f32.mrf.mxu0 }
 0x130   :  { %v2060_v46 = vsel %vm112_vm6, 0.0, %v196_v44  ;;  %v483_v5 = vmul.f32 %v1770_v0, %v2047_v33  ;;  %v1772_v13 = vpop.eup %1771  ;;  %v2089_v11 = vmax.f32 %v893_v15, 1e-24  ;;  %vm735_vm6 = vmor %vm733_vm5, %vm734_vm4  ;;  %vm489_vm7 = vweird.f32 %v1770_v0  ;;  %v1741_v44 = vld [vmem:[#allocation4 + $0x6] ss:$0 sm:$0xff] }
 0x131   :  { %v198_v51 = vsel %vm44_vm0, %v2060_v46, 0.0  ;;  %v560_v20 = vmul.f32 %v1772_v13, %v2070_v56  ;;  %vm490_vm9 = vmor %vm488_vm8, %vm489_vm7  ;;  %vm566_vm10 = vweird.f32 %v1772_v13  ;;  %v1319_v47 = vmul.f32 2.0, %v2104_v42  ;;  %v2117_v56 = vld [vmem:[#allocation4 + $0x2] sm:$0x1] }
 0x132   :  { %v2065_v55 = vpop.f32.mrf.mxu2  ;;  %199 = vadd.xlane.f32.xlu1 %v198_v51  ;;  %v484_v10 = vmul.f32 %v1770_v0, %v483_v5  ;;  %1773 = vrsqrt.f32 %v2089_v11  ;;  %vm567_vm12 = vmor %vm565_vm11, %vm566_vm10  ;;  %v2119_v5 = vld [vmem:[#allocation5 + $0x4] sm:$0x1]  ;;  %vm901_vm14 = vweird.f32 %v2089_v11  ;;  %vm992_vm2 = vweird.f32 %v2097_v35 }
 0x133   :  { %v2068_v49 = vmul.f32 2.0, %v2065_v55  ;;  %448 = vperm.xlu2 %1726, %v443_v3   ;;  %v730_v3 = vmul.f32 0.5, %v729_v62  ;;  %v561_v25 = vmul.f32 %v1772_v13, %v560_v20  ;;  %v2101_v41 = vpop.f32.mrf.mxu3  ;;  %1775 = vrsqrt.f32 %v2097_v35 }
 0x134   :  { %v485_v18 = vmul.f32 0.5, %v484_v10 }
 0x135   :  { %861 = vperm.xlu0 %1727, %v856_v59   ;;  %v1152_v1 = vsub.f32 %v2073_v63, %v2068_v49  ;;  %v731_v9 = vsub.f32 1.5, %v730_v3  ;;  %v562_v34 = vmul.f32 0.5, %v561_v25  ;;  %v1318_v59 = vadd.f32 %v1741_v44, %v1987_v30  ;;  %v1742_v3 = vld [vmem:[#allocation5 + $0x7] ss:$0 sm:$0xff] }
 0x136   :  { %v486_v24 = vsub.f32 1.5, %v485_v18  ;;  %v1563_v10 = vadd.f32 %v1742_v3, %v1997_v39  ;;  %v2130_v18 = vld [vmem:[#allocation4 + $0x6] sm:$0x1] }
 0x137   :  { %v732_v17 = vmul.f32 %v1768_v43, %v731_v9  ;;  %v563_v38 = vsub.f32 1.5, %v562_v34  ;;  %v1320_v60 = vsub.f32 %v1318_v59, %v1319_v47  ;;  %v2143_v34 = vld [vmem:[#allocation5 + $0x7] sm:$0x1]  ;;  %v815_v59 = vmul.f32 2.0, %v2042_v27 }
 0x138   :  { %v487_v32 = vmul.f32 %v1770_v0, %v486_v24  ;;  %v1774_v40 = vpop.eup %1773  ;;  %2949 = vst [vmem:[#allocation17_spill] sm:$0xff] %v2143_v34 }
 0x139   :  { %v564_v33 = vmul.f32 %v1772_v13, %v563_v38  ;;  %v1776_v51 = vpop.eup %1775  ;;  %v2123_v7 = vmax.f32 %v1320_v60, 1e-24  ;;  %vm902_vm13 = vweird.f32 %v1774_v40  ;;  %v2152_v60 = vld [vmem:[#allocation5 + $0x6] sm:$0x1] }
 0x13a   :  { %v987_v2 = vmul.f32 %v1776_v51, %v2097_v35  ;;  %vm903_vm15 = vmor %vm901_vm14, %vm902_vm13  ;;  %vm993_vm1 = vweird.f32 %v1776_v51 }
 0x13b   :  { %525 = vperm.xlu2 %1726, %v520_v22   ;;  %v736_v22 = vsel %vm735_vm6, %v1768_v43, %v732_v17  ;;  %v896_v43 = vmul.f32 %v1774_v40, %v2089_v11  ;;  %v568_v48 = vsel %vm567_vm12, %v1772_v13, %v564_v33  ;;  %v1528_v62 = vpop.f32.mrf.mxu3  ;;  %1777 = vrsqrt.f32 %v2123_v7  ;;  %v2128_v17 = vld [vmem:[#allocation5 + $0x2] sm:$0x1]  ;;  %vm994_vm3 = vmor %vm992_vm2, %vm993_vm1 }
 0x13c   :  { %v1564_v6 = vmul.f32 2.0, %v1528_v62  ;;  %v988_v9 = vmul.f32 %v1776_v51, %v987_v2  ;;  %v310_v11 = vmax.f32 %v309_v57, 1e-24  ;;  %vm1328_vm5 = vweird.f32 %v2123_v7 }
 0x13d   :  { %662 = vperm.xlu0 %1727, %v659_v8   ;;  %v897_v50 = vmul.f32 %v1774_v40, %v896_v43  ;;  %v2148_v43 = vld [vmem:[#allocation4 + $0x5] sm:$0x1] }
 0x13e   :  { %v1565_v13 = vsub.f32 %v1563_v10, %v1564_v6  ;;  %v989_v15 = vmul.f32 0.5, %v988_v9  ;;  %vm317_vm11 = vweird.f32 %v310_v11 }
 0x140   :  { %v990_v52 = vsub.f32 1.5, %v989_v15 }
 0x141   :  { %v1778_v21 = vpop.eup %1777 }
 0x142   :  { %v991_v24 = vmul.f32 %v1776_v51, %v990_v52  ;;  %v1323_v25 = vmul.f32 %v1778_v21, %v2123_v7  ;;  %vm1329_vm4 = vweird.f32 %v1778_v21 }
 0x143   :  { %616 = vperm.xlu2 %1726, %v1995_v37   ;;  %v491_v37 = vsel %vm490_vm9, %v1770_v0, %v487_v32  ;;  %v898_v0 = vmul.f32 0.5, %v897_v50  ;;  %v2141_v32 = vld [vmem:[#allocation5 + $0x3] sm:$0x1]  ;;  %vm1330_vm6 = vmor %vm1328_vm5, %vm1329_vm4 }
 0x144   :  { %v1324_v38 = vmul.f32 %v1778_v21, %v1323_v25 }
 0x145   :  { %739 = vperm.xlu0 %1727, %v736_v22   ;;  %v899_v8 = vsub.f32 1.5, %v898_v0  ;;  %v1734_v22 = vld [vmem:[#allocation5] ss:$0 sm:$0xff] }
 0x146   :  { %v387_v31 = vadd.f32 %v1734_v22, %v1997_v39  ;;  %v1325_v54 = vmul.f32 0.5, %v1324_v38 }
 0x147   :  { %v900_v14 = vmul.f32 %v1774_v40, %v899_v8 }
 0x148   :  { %v389_v53 = vsub.f32 %v387_v31, %v388_v26  ;;  %v1326_v35 = vsub.f32 1.5, %v1325_v54  ;;  %v1732_v31 = vld [vmem:[#allocation5 + $0x5] ss:$0 sm:$0xff] }
 0x149   :  { %v904_v20 = vsel %vm903_vm15, %v1774_v40, %v900_v14 }
 0x14a   :  { %v390_v58 = vmax.f32 %v389_v53, 1e-24  ;;  %v1327_v50 = vmul.f32 %v1778_v21, %v1326_v35 }
 0x14b   :  { %693 = vperm.xlu2 %1726, %v2021_v61   ;;  %460 = vperm.xlu1 %1728, %v2094_v19   ;;  %v2109_v61 = vld [vmem:[#allocation5 + $0x1] sm:$0x1] }
 0x14c   :  { %v1331_v6 = vsel %vm1330_vm6, %v1778_v21, %v1327_v50  ;;  %vm397_vm14 = vweird.f32 %v390_v58 }
 0x14d   :  { %494 = vperm.xlu0 %1727, %v491_v37   ;;  %v995_v37 = vsel %vm994_vm3, %v1776_v51, %v991_v24 }
 0x153   :  { %796 = vperm.xlu2 %1726, %v2107_v45   ;;  %537 = vperm.xlu1 %1728, %v2109_v61  }
 0x155   :  { %571 = vperm.xlu0 %1727, %v568_v48   ;;  %v1738_v48 = vld [vmem:[#allocation4 + $0x3] ss:$0 sm:$0xff] }
 0x156   :  { %v814_v3 = vadd.f32 %v1738_v48, %v1987_v30 }
 0x158   :  { %v816_v8 = vsub.f32 %v814_v3, %v815_v59 }
 0x15a   :  { %v817_v14 = vmax.f32 %v816_v8, 1e-24 }
 0x15b   :  { %1041 = vperm.xlu2 %1726, %v2119_v5   ;;  %628 = vperm.xlu1 %1728, %v2117_v56  }
 0x15c   :  { %vm824_vm2 = vweird.f32 %v817_v14 }
 0x15d   :  { %1120 = vperm.xlu0 %1727, %v2065_v55   ;;  %v1566_v55 = vmax.f32 %v1565_v13, 1e-24 }
 0x15f   :  { %1779 = vrsqrt.f32 %v1566_v55  ;;  %vm1573_vm8 = vweird.f32 %v1566_v55 }
 0x160   :  { %1781 = vrsqrt.f32 %v310_v11 }
 0x161   :  { %1783 = vrsqrt.f32 %v390_v58 }
 0x162   :  { %1785 = vrsqrt.f32 %v817_v14 }
 0x163   :  { %1300 = vperm.xlu2 %1726, %v2130_v18   ;;  %705 = vperm.xlu1 %1728, %v2128_v17  }
 0x165   :  { %907 = vperm.xlu0 %1727, %v904_v20   ;;  %v1780_v40 = vpop.eup %1779 }
 0x166   :  { %v1568_v57 = vmul.f32 %v1780_v40, %v1566_v55  ;;  %v1782_v33 = vpop.eup %1781  ;;  %vm1574_vm7 = vweird.f32 %v1780_v40 }
 0x167   :  { %v312_v47 = vmul.f32 %v1782_v33, %v310_v11  ;;  %v1784_v2 = vpop.eup %1783  ;;  %vm1575_vm9 = vmor %vm1573_vm8, %vm1574_vm7  ;;  %vm318_vm10 = vweird.f32 %v1782_v33  ;;  %v1451_v11 = vpop.f32.mrf.mxu2 }
 0x168   :  { %v1569_v44 = vmul.f32 %v1780_v40, %v1568_v57  ;;  %v392_v10 = vmul.f32 %v1784_v2, %v390_v58  ;;  %vm319_vm12 = vmor %vm317_vm11, %vm318_vm10  ;;  %v1786_v25 = vpop.eup %1785  ;;  %vm398_vm13 = vweird.f32 %v1784_v2  ;;  %v1735_v57 = vld [vmem:[#allocation4 + $0x7] ss:$0 sm:$0xff]  ;;  %v1487_v35 = vmul.f32 2.0, %v1451_v11 }
 0x169   :  { %v313_v0 = vmul.f32 %v1782_v33, %v312_v47  ;;  %v819_v55 = vmul.f32 %v1786_v25, %v817_v14  ;;  %vm399_vm15 = vmor %vm397_vm14, %vm398_vm13  ;;  %v1486_v48 = vadd.f32 %v1735_v57, %v1987_v30  ;;  %vm825_vm1 = vweird.f32 %v1786_v25 }
 0x16a   :  { %v1570_v51 = vmul.f32 0.5, %v1569_v44  ;;  %v393_v20 = vmul.f32 %v1784_v2, %v392_v10  ;;  %v2160_v44 = vpop.f32.mrf.mxu1  ;;  %vm826_vm3 = vmor %vm824_vm2, %vm825_vm1 }
 0x16b   :  { %1545 = vperm.xlu2 %1726, %v2143_v34   ;;  %873 = vperm.xlu1 %1728, %v2141_v32   ;;  %v314_v9 = vmul.f32 0.5, %v313_v0  ;;  %v820_v38 = vmul.f32 %v1786_v25, %v819_v55  ;;  %v1488_v58 = vsub.f32 %v1486_v48, %v1487_v35 }
 0x16c   :  { %v394_v21 = vmul.f32 0.5, %v393_v20 }
 0x16d   :  { %998 = vperm.xlu0 %1727, %v995_v37   ;;  %v315_v15 = vsub.f32 1.5, %v314_v9  ;;  %v821_v54 = vmul.f32 0.5, %v820_v38 }
 0x16e   :  { %v395_v24 = vsub.f32 1.5, %v394_v21 }
 0x16f   :  { %v316_v52 = vmul.f32 %v1782_v33, %v315_v15  ;;  %v822_v47 = vsub.f32 1.5, %v821_v54 }
 0x170   :  { %v396_v26 = vmul.f32 %v1784_v2, %v395_v24 }
 0x171   :  { %v320_v22 = vsel %vm319_vm12, %v1782_v33, %v316_v52  ;;  %v823_v59 = vmul.f32 %v1786_v25, %v822_v47 }
 0x172   :  { %v400_v37 = vsel %vm399_vm15, %v1784_v2, %v396_v26  ;;  %v1489_v2 = vmax.f32 %v1488_v58, 1e-24 }
 0x173   :  { %1132 = vperm.xlu1 %1728, %v2148_v43  }
 0x174   :  { %vm1496_vm8 = vweird.f32 %v1489_v2 }
 0x175   :  { %1533 = vperm.xlu0 %1727, %v1528_v62   ;;  %v1571_v62 = vsub.f32 1.5, %v1570_v51 }
 0x177   :  { %v1572_v13 = vmul.f32 %v1780_v40, %v1571_v62 }
 0x179   :  { %v1576_v7 = vsel %vm1575_vm9, %v1780_v40, %v1572_v13  ;;  %v1227_v40 = vadd.f32 %v1732_v31, %v1997_v39 }
 0x17b   :  { %1377 = vperm.xlu1 %1728, %v2152_v60  }
 0x17d   :  { %1334 = vperm.xlu0 %1727, %v1331_v6   ;;  %v827_v6 = vsel %vm826_vm3, %v1786_v25, %v823_v59 }
 0x183   :  { %784 = vperm.xlu1 %1728, %v2042_v27   ;;  %v1228_v27 = vmul.f32 2.0, %v2101_v41 }
 0x185   :  { %1579 = vperm.xlu0 %1727, %v1576_v7   ;;  %v1229_v53 = vsub.f32 %v1227_v40, %v1228_v27  ;;  %v2164_v7 = vpop.f32.mrf.mxu1 }
 0x187   :  { %v1230_v33 = vmax.f32 %v1229_v53, 1e-24 }
 0x189   :  { %1787 = vrsqrt.f32 %v1230_v33  ;;  %vm1237_vm5 = vweird.f32 %v1230_v33 }
 0x18a   :  { %1789 = vrsqrt.f32 %v1489_v2 }
 0x18b   :  { %323 = vperm.xlu1 %1728, %v320_v22  }
 0x18f   :  { %v1788_v62 = vpop.eup %1787 }
 0x190   :  { %v1232_v30 = vmul.f32 %v1788_v62, %v1230_v33  ;;  %v1790_v22 = vpop.eup %1789  ;;  %vm1238_vm4 = vweird.f32 %v1788_v62 }
 0x191   :  { %v1491_v24 = vmul.f32 %v1790_v22, %v1489_v2  ;;  %vm1239_vm6 = vmor %vm1237_vm5, %vm1238_vm4  ;;  %vm1497_vm7 = vweird.f32 %v1790_v22 }
 0x192   :  { %v1233_v21 = vmul.f32 %v1788_v62, %v1232_v30  ;;  %vm1498_vm9 = vmor %vm1496_vm8, %vm1497_vm7 }
 0x193   :  { %403 = vperm.xlu1 %1728, %v400_v37   ;;  %v1492_v27 = vmul.f32 %v1790_v22, %v1491_v24 }
 0x194   :  { %v1234_v26 = vmul.f32 0.5, %v1233_v21 }
 0x195   :  { %v1493_v38 = vmul.f32 0.5, %v1492_v27 }
 0x196   :  { %v1235_v31 = vsub.f32 1.5, %v1234_v26 }
 0x197   :  { %v1494_v53 = vsub.f32 1.5, %v1493_v38  ;;  %v1060_v38 = vmul.f32 2.0, %v2160_v44 }
 0x198   :  { %v1236_v37 = vmul.f32 %v1788_v62, %v1235_v31 }
 0x199   :  { %v1495_v54 = vmul.f32 %v1790_v22, %v1494_v53  ;;  %v2172_v53 = vpop.permute.xlu2 %277 }
 0x19a   :  { %v1240_v40 = vsel %vm1239_vm6, %v1788_v62, %v1236_v37  ;;  %v1740_v37 = vld [vmem:[#allocation5 + $0x4] ss:$0 sm:$0xff] }
 0x19b   :  { %1029 = vperm.xlu1 %1728, %v2160_v44   ;;  %v1499_v57 = vsel %vm1498_vm9, %v1790_v22, %v1495_v54 }
 0x19d   :  { %v155_v50 = vpop.xlane.xlu1 %154 }
 0x19e   :  { %v156_v51 = vrot.slane %v155_v50, 4 }
 0x1a0   :  { %v157_v0 = vadd.f32 %v156_v51, %v155_v50 }
 0x1a2   :  { %v158_v3 = vrot.slane %v157_v0, 2 }
 0x1a3   :  { %830 = vperm.xlu1 %1728, %v827_v6  }
 0x1a4   :  { %v159_v8 = vadd.f32 %v158_v3, %v157_v0 }
 0x1a5   :  { %v200_v9 = vpop.xlane.xlu1 %199 }
 0x1a6   :  { %v201_v10 = vrot.slane %v200_v9, 4  ;;  %v160_v13 = vrot.slane %v159_v8, 1 }
 0x1a8   :  { %v202_v15 = vadd.f32 %v201_v10, %v200_v9  ;;  %v161_v20 = vadd.f32 %v160_v13, %v159_v8 }
 0x1aa   :  { %v203_v52 = vrot.slane %v202_v15, 2  ;;  %1680 = vpush %v161_v20 }
 0x1ab   :  { %1365 = vperm.xlu1 %1728, %v2164_v7  }
 0x1ac   :  { %v204_v14 = vadd.f32 %v203_v52, %v202_v15 }
 0x1ae   :  { %v205_v25 = vrot.slane %v204_v14, 1 }
 0x1b0   :  { %v206_v55 = vadd.f32 %v205_v25, %v204_v14 }
 0x1b2   :  { %1682 = vpush %v206_v55 }
 0x1b3   :  { %1456 = vperm.xlu1 %1728, %v1451_v11  }
 0x1bb   :  { %1243 = vperm.xlu1 %1728, %v1240_v40   ;;  %v1059_v40 = vadd.f32 %v1740_v37, %v1997_v39 }
 0x1c3   :  { %1502 = vperm.xlu1 %1728, %v1499_v57   ;;  %v1745_v57 = vld [vmem:[#allocation5 + $0x6] ss:$0 sm:$0xff] }
 0x1db   :  { %s1681_s0 = spop %1680 }
 0x1dc   :  { %s163_s1 = smul.f32 0.017857144, %s1681_s0 }
 0x1de   :  { %s164_s19 = sadd.f32 1e-07, %s163_s1 }
 0x1e0   :  { %v165_v35 = vstv %s164_s19  ;;  %s1910_s19 = smov [#allocation11]  }
 0x1e1   :  { %1791 = vrcp.f32 %v165_v35  ;;  %v177_v0 = vand.u32 2147483648, %v165_v35  ;;  %vm171_vm11 = vweird.f32 %v165_v35  ;;  %v175_v2 = vand.u32 2147483647, %v165_v35 }
 0x1e3   :  { %s1683_s20 = spop %1682  ;;  %v178_v30 = vor.u32 1.1754944e-38, %v177_v0  ;;  %vm176_vm14 = vcmp.eq.f32.partialorder %v175_v2, 8.507059e+37 }
 0x1e4   :  { %s208_s21 = smul.f32 0.017857144, %s1683_s20 }
 0x1e6   :  { %s209_s22 = sadd.f32 1e-07, %s208_s21 }
 0x1e7   :  { %v1792_v11 = vpop.eup %1791 }
 0x1e8   :  { %v210_v33 = vstv %s209_s22  ;;  %v167_v47 = vmul.f32 %v1792_v11, %v165_v35  ;;  %vm172_vm10 = vweird.f32 %v1792_v11  ;;  %v1396_v35 = vmul.f32 2.0, %v2164_v7 }
 0x1e9   :  { %1793 = vrcp.f32 %v210_v33  ;;  %vm173_vm12 = vmor %vm171_vm11, %vm172_vm10  ;;  %v222_v6 = vand.u32 2147483648, %v210_v33  ;;  %v220_v9 = vand.u32 2147483647, %v210_v33  ;;  %vm216_vm15 = vweird.f32 %v210_v33 }
 0x1ea   :  { %v168_v48 = vsub.f32 1.0, %v167_v47  ;;  %v1395_v47 = vadd.f32 %v1745_v57, %v1997_v39  ;;  %v2186_v39 = vpop.permute.xlu1 %460 }
 0x1eb   :  { %v223_v15 = vor.u32 1.1754944e-38, %v222_v6  ;;  %vm221_vm2 = vcmp.eq.f32.partialorder %v220_v9, 8.507059e+37 }
 0x1ec   :  { %v169_v58 = vmul.f32 %v1792_v11, %v168_v48  ;;  %v1397_v44 = vsub.f32 %v1395_v47, %v1396_v35 }
 0x1ee   :  { %v170_v51 = vadd.f32 %v1792_v11, %v169_v58 }
 0x1ef   :  { %v1794_v50 = vpop.eup %1793 }
 0x1f0   :  { %v212_v59 = vmul.f32 %v1794_v50, %v210_v33  ;;  %v174_v62 = vsel %vm173_vm12, %v1792_v11, %v170_v51  ;;  %vm217_vm13 = vweird.f32 %v1794_v50  ;;  %v1153_v11 = vmax.f32 %v1152_v1, 1e-24 }
 0x1f1   :  { %v179_v13 = vsel %vm176_vm14, %v178_v30, %v174_v62  ;;  %vm218_vm1 = vmor %vm216_vm15, %vm217_vm13  ;;  %v290_v30 = vpop.permute.xlu0 %289 }
 0x1f2   :  { %v213_v3 = vsub.f32 1.0, %v212_v59  ;;  %v180_v21 = vmul.f32 %v179_v13, %v2037_v23  ;;  %v1061_v23 = vsub.f32 %v1059_v40, %v1060_v38  ;;  %vm1160_vm8 = vweird.f32 %v1153_v11 }
 0x1f4   :  { %v214_v8 = vmul.f32 %v1794_v50, %v213_v3  ;;  %v1062_v54 = vmax.f32 %v1061_v23, 1e-24 }
 0x1f6   :  { %v215_v10 = vadd.f32 %v1794_v50, %v214_v8  ;;  %1795 = vrsqrt.f32 %v1062_v54  ;;  %vm1069_vm5 = vweird.f32 %v1062_v54 }
 0x1f7   :  { %1797 = vrsqrt.f32 %v1153_v11 }
 0x1f8   :  { %v219_v20 = vsel %vm218_vm1, %v1794_v50, %v215_v10  ;;  %v1398_v50 = vmax.f32 %v1397_v44, 1e-24  ;;  %v2190_v10 = vpop.permute.xlu1 %537  ;;  %v292_v44 = vadd.f32 %v290_v30, %v1985_v28 }
 0x1f9   :  { %v224_v52 = vsel %vm221_vm2, %v223_v15, %v219_v20 }
 0x1fa   :  { %v225_v22 = vmul.f32 %v224_v52, %v2060_v46  ;;  %v2174_v46 = vpop.permute.xlu2 %357  ;;  %1799 = vrsqrt.f32 %v1398_v50  ;;  %vm1405_vm11 = vweird.f32 %v1398_v50 }
 0x1fc   :  { %v226_v14 = vsub.f32 %v225_v22, %v180_v21  ;;  %v1796_v33 = vpop.eup %1795  ;;  %v965_v21 = vpop.permute.xlu0 %964 }
 0x1fd   :  { %v1064_v58 = vmul.f32 %v1796_v33, %v1062_v54  ;;  %v1798_v59 = vpop.eup %1797  ;;  %vm1070_vm4 = vweird.f32 %v1796_v33 }
 0x1fe   :  { %v227_v24 = vand.u32 2147483647, %v226_v14  ;;  %v229_v25 = vmul.f32 0.5, %v226_v14  ;;  %v1155_v0 = vmul.f32 %v1798_v59, %v1153_v11  ;;  %vm1071_vm6 = vmor %vm1069_vm5, %vm1070_vm4  ;;  %vm1161_vm7 = vweird.f32 %v1798_v59  ;;  %v330_v11 = vld [vmem:[#allocation3] sm:$0x1] }
 0x1ff   :  { %v1065_v51 = vmul.f32 %v1796_v33, %v1064_v58  ;;  %vm1162_vm9 = vmor %vm1160_vm8, %vm1161_vm7  ;;  %v373_v58 = vmul.f32 2.0, %v330_v11 }
 0x200   :  { %vm228_vm3 = vcmp.lt.f32.partialorder %v227_v24, 1.0  ;;  %v230_v26 = vmul.f32 %v229_v25, %v226_v14  ;;  %v1631_v55 = vadd.f32 -0.5, %v227_v24  ;;  %v1156_v63 = vmul.f32 %v1798_v59, %v1155_v0  ;;  %v1800_v1 = vpop.eup %1799  ;;  %v2194_v14 = vpop.permute.xlu1 %628 }
 0x201   :  { %v1066_v7 = vmul.f32 0.5, %v1065_v51  ;;  %v1400_v6 = vmul.f32 %v1800_v1, %v1398_v50  ;;  %vm1406_vm10 = vweird.f32 %v1800_v1 }
 0x202   :  { %v232_v31 = vsel %vm228_vm3, %v230_v26, %v1631_v55  ;;  %v370_v48 = vpop.permute.xlu2 %369  ;;  %v1157_v3 = vmul.f32 0.5, %v1156_v63  ;;  %vm1407_vm12 = vmor %vm1405_vm11, %vm1406_vm10  ;;  %v1173_v63 = vld [vmem:[#allocation3 + $0x5] sm:$0x1] }
 0x203   :  { %v233_v27 = vsel %vm44_vm0, %v232_v31, 0.0  ;;  %v1067_v49 = vsub.f32 1.5, %v1066_v7  ;;  %v1401_v9 = vmul.f32 %v1800_v1, %v1400_v6  ;;  %v372_v47 = vadd.f32 %v370_v48, %v1993_v36 }
 0x204   :  { %234 = vadd.xlane.f32.xlu2 %v233_v27  ;;  %v1158_v8 = vsub.f32 1.5, %v1157_v3  ;;  %v1210_v26 = vpop.permute.xlu0 %1209 }
 0x205   :  { %v374_v51 = vsub.f32 %v372_v47, %v373_v58  ;;  %v424_v47 = vld [vmem:[#allocation2 + $0x1] sm:$0x1]  ;;  %v1005_v58 = vld [vmem:[#allocation3 + $0x4] sm:$0x1] }
 0x206   :  { %v1159_v13 = vmul.f32 %v1798_v59, %v1158_v8  ;;  %v1213_v8 = vmul.f32 2.0, %v1173_v63  ;;  %v592_v63 = vld [vmem:[#allocation2 + $0x2] sm:$0x1] }
 0x208   :  { %v1163_v15 = vsel %vm1162_vm9, %v1798_v59, %v1159_v13  ;;  %v2198_v55 = vpop.permute.xlu1 %705  ;;  %v928_v59 = vld [vmem:[#allocation2 + $0x4] sm:$0x1] }
 0x209   :  { %v968_v6 = vmul.f32 2.0, %v928_v59  ;;  %v1264_v59 = vld [vmem:[#allocation2 + $0x6] sm:$0x1] }
 0x20a   :  { %v2183_v2 = vpop.permute.xlu2 %448 }
 0x20c   :  { %v1469_v27 = vpop.permute.xlu0 %1468 }
 0x20d   :  { %v1471_v48 = vadd.f32 %v1469_v27, %v1985_v28 }
 0x210   :  { %v2200_v37 = vpop.permute.xlu1 %873 }
 0x212   :  { %v2188_v62 = vpop.permute.xlu2 %525 }
 0x214   :  { %v2204_v40 = vpop.permute.xlu0 %861 }
 0x215   :  { %2952 = vst [vmem:[#allocation20_spill] sm:$0xff] %v2204_v40 }
 0x218   :  { %v2206_v23 = vpop.permute.xlu1 %1132 }
 0x21a   :  { %v2192_v52 = vpop.permute.xlu2 %616 }
 0x21b   :  { %2950 = vst [vmem:[#allocation18_spill] sm:$0xff] %v2192_v52 }
 0x21c   :  { %952 = vperm.xlu2 %1726, %v2084_v16   ;;  %v1068_v16 = vmul.f32 %v1796_v33, %v1067_v49  ;;  %v2210_v57 = vpop.permute.xlu0 %662  ;;  %v967_v49 = vadd.f32 %v965_v21, %v1985_v28  ;;  %v760_v21 = vld [vmem:[#allocation2 + $0x3] sm:$0x1] }
 0x21d   :  { %2953 = vst [vmem:[#allocation21_spill] sm:$0xff] %v2210_v57 }
 0x21e   :  { %v969_v13 = vsub.f32 %v967_v49, %v968_v6  ;;  %v1509_v49 = vld [vmem:[#allocation3 + $0x7] sm:$0x1]  ;;  %v1045_v6 = vmul.f32 2.0, %v1005_v58  ;;  %v1096_v58 = vld [vmem:[#allocation2 + $0x5] sm:$0x1] }
 0x21f   :  { %v2285_v4 = vmul.f32 2.0, %v1096_v58 }
 0x220   :  { %v2212_v35 = vpop.permute.xlu1 %1377 }
 0x222   :  { %v2196_v25 = vpop.permute.xlu2 %693 }
 0x223   :  { %2951 = vst [vmem:[#allocation19_spill] sm:$0xff] %v2196_v25 }
 0x224   :  { %1197 = vperm.xlu2 %1726, %v2101_v41   ;;  %v1072_v41 = vsel %vm1071_vm6, %v1796_v33, %v1068_v16  ;;  %v250_v33 = vld [vmem:[#allocation2] sm:$0x1]  ;;  %v1432_v16 = vld [vmem:[#allocation2 + $0x7] sm:$0x1]  ;;  %v2220_v3 = vpop.permute.xlu0 %739 }
 0x225   :  { %v293_v50 = vmul.f32 2.0, %v250_v33  ;;  %2954 = vst [vmem:[#allocation22_spill] sm:$0xff] %v2220_v3  ;;  %v800_v33 = vmul.f32 2.0, %v760_v21  ;;  %v2251_v21 = vmul.f32 2.0, %v1509_v49  ;;  %v2261_v3 = vld [vmem:[#allocation2] sm:$0xff] }
 0x226   :  { %v280_v57 = vsub.f32 %v2261_v3, %v2172_v53 }
 0x227   :  { %v294_v0 = vsub.f32 %v292_v44, %v293_v50 }
 0x229   :  { %v2227_v30 = vmax.f32 %v294_v0, 1e-24 }
 0x22a   :  { %v797_v31 = vpop.permute.xlu2 %796 }
 0x22b   :  { %vm302_vm14 = vweird.f32 %v2227_v30 }
 0x22c   :  { %1288 = vperm.xlu2 %1726, %v2104_v42   ;;  %v1402_v42 = vmul.f32 0.5, %v1401_v9  ;;  %v2225_v9 = vpop.permute.xlu1 %784  ;;  %v2238_v0 = vpop.permute.xlu0 %494 }
 0x22d   :  { %2955 = vst [vmem:[#allocation23_spill] sm:$0xff] %v2225_v9 }
 0x22e   :  { %v1403_v20 = vsub.f32 1.5, %v1402_v42  ;;  %v1472_v42 = vmul.f32 2.0, %v1432_v16  ;;  %2956 = vst [vmem:[#allocation24_spill] sm:$0xff] %v2238_v0  ;;  %v2265_v0 = vld [vmem:[#allocation3] sm:$0xff] }
 0x230   :  { %v1404_v22 = vmul.f32 %v1800_v1, %v1403_v20  ;;  %v1473_v20 = vsub.f32 %v1471_v48, %v1472_v42  ;;  %v2244_v48 = vmul.f32 2.0, %v424_v47  ;;  %v669_v42 = vld [vmem:[#allocation3 + $0x2] sm:$0x1]  ;;  %v2259_v47 = vmul.f32 2.0, %v592_v63 }
 0x231   :  { %v463_v63 = vadd.f32 %v2186_v39, %v1985_v28  ;;  %v2277_v53 = vmul.f32 2.0, %v669_v42  ;;  %v540_v39 = vadd.f32 %v2190_v10, %v1993_v36 }
 0x232   :  { %v1408_v24 = vsel %vm1407_vm12, %v1800_v1, %v1404_v22  ;;  %v2202_v38 = vpop.permute.xlu2 %1041  ;;  %v1212_v1 = vadd.f32 %v1210_v26, %v1993_v36  ;;  %v799_v22 = vadd.f32 %v797_v31, %v1985_v28  ;;  %v2232_v26 = vmax.f32 %v969_v13, 1e-24  ;;  %v501_v31 = vld [vmem:[#allocation3 + $0x1] sm:$0x1] }
 0x233   :  { %v2236_v44 = vmax.f32 %v1473_v20, 1e-24  ;;  %v1304_v20 = vmul.f32 2.0, %v1264_v59  ;;  %v1341_v59 = vld [vmem:[#allocation3 + $0x6] sm:$0x1] }
 0x234   :  { %1075 = vperm.xlu2 %1726, %v1072_v41   ;;  %v2223_v41 = vmax.f32 %v374_v51, 1e-24  ;;  %v801_v51 = vsub.f32 %v799_v22, %v800_v33  ;;  %v2257_v33 = vmul.f32 2.0, %v501_v31  ;;  %v2292_v42 = vmul.f32 2.0, %v1341_v59  ;;  %v2305_v10 = vpop.permute.xlu0 %571 }
 0x235   :  { %v708_v59 = vadd.f32 %v2198_v55, %v1993_v36  ;;  %vm977_vm3 = vweird.f32 %v2232_v26  ;;  %vm1481_vm11 = vweird.f32 %v2236_v44 }
 0x236   :  { %1801 = vrsqrt.f32 %v2223_v41  ;;  %v542_v55 = vsub.f32 %v540_v39, %v2257_v33  ;;  %vm382_vm13 = vweird.f32 %v2223_v41 }
 0x237   :  { %1803 = vrsqrt.f32 %v2227_v30 }
 0x238   :  { %1805 = vrsqrt.f32 %v2232_v26 }
 0x23a   :  { %v2208_v54 = vpop.permute.xlu2 %1300 }
 0x23c   :  { %1166 = vperm.xlu2 %1726, %v1163_v15   ;;  %v1214_v15 = vsub.f32 %v1212_v1, %v1213_v8  ;;  %v2241_v16 = vpop.eup %1801  ;;  %v2246_v8 = vpop.permute.xlu1 %323 }
 0x23d   :  { %2957 = vst [vmem:[#allocation25_spill] sm:$0xff] %v2246_v8  ;;  %v2248_v13 = vpop.eup %1803  ;;  %v377_v49 = vmul.f32 %v2241_v16, %v2223_v41  ;;  %v1744_v8 = vld [vmem:[#allocation2] ss:$0 sm:$0xff]  ;;  %vm383_vm15 = vweird.f32 %v2241_v16 }
 0x23e   :  { %v2234_v11 = vmax.f32 %v1214_v15, 1e-24  ;;  %v837_v15 = vld [vmem:[#allocation3 + $0x3] sm:$0x1]  ;;  %v297_v31 = vmul.f32 %v2248_v13, %v2227_v30  ;;  %v2296_v52 = vsub.f32 %v280_v57, %v1744_v8  ;;  %v1835_v57 = vld [vmem:[#allocation4] sm:$0x1]  ;;  %vm303_vm1 = vweird.f32 %v2248_v13  ;;  %vm2401_vm2 = vmor %vm382_vm13, %vm383_vm15 }
 0x23f   :  { %v2283_v12 = vmul.f32 2.0, %v837_v15  ;;  %v378_v58 = vmul.f32 %v2241_v16, %v377_v49  ;;  %vm2415_vm4 = vmor %vm302_vm14, %vm303_vm1  ;;  %v1748_v30 = vld [vmem:[#allocation3 + $0x1] ss:$0 sm:$0xff] }
 0x240   :  { %1807 = vrsqrt.f32 %v2234_v11  ;;  %vm1222_vm7 = vweird.f32 %v2234_v11 }
 0x241   :  { %1809 = vrsqrt.f32 %v2236_v44  ;;  %v379_v49 = vmul.f32 0.5, %v378_v58  ;;  %v1747_v58 = vld [vmem:[#allocation2 + $0x1] ss:$0 sm:$0xff] }
 0x242   :  { %v2216_v7 = vpop.permute.xlu2 %1545 }
 0x244   :  { %1411 = vperm.xlu2 %1726, %v1408_v24  }
 0x277   :  { %v235_v24 = vpop.xlane.xlu2 %234 }
 0x278   :  { %v236_v27 = vrot.slane %v235_v24, 4 }
 0x27a   :  { %v237_v50 = vadd.f32 %v236_v27, %v235_v24  ;;  %v2253_v24 = vmax.f32 %v801_v51, 1e-24  ;;  %v1044_v27 = vadd.f32 %v2202_v38, %v1993_v36  ;;  %v1303_v51 = vadd.f32 %v2208_v54, %v1985_v28 }
 0x27b   :  { %v1548_v54 = vadd.f32 %v2216_v7, %v1993_v36 }
 0x27c   :  { %v238_v1 = vrot.slane %v237_v50, 2  ;;  %1811 = vrsqrt.f32 %v2253_v24  ;;  %v1046_v25 = vsub.f32 %v1044_v27, %v1045_v6  ;;  %v1305_v15 = vsub.f32 %v1303_v51, %v1304_v20 }
 0x27d   :  { %v298_v6 = vmul.f32 %v2248_v13, %v297_v31  ;;  %v465_v27 = vsub.f32 %v463_v63, %v2244_v48  ;;  %v876_v20 = vadd.f32 %v2200_v37, %v1993_v36  ;;  %v1135_v51 = vadd.f32 %v2206_v23, %v1985_v28 }
 0x27e   :  { %v239_v22 = vadd.f32 %v238_v1, %v237_v50  ;;  %v360_v50 = vsub.f32 %v2265_v0, %v2174_v46  ;;  %v2279_v1 = vpop.eup %1805  ;;  %v1746_v46 = vld [vmem:[#allocation3] ss:$0 sm:$0xff]  ;;  %v2329_v37 = vmax.f32 %v1305_v15, 1e-24  ;;  %vm809_vm14 = vweird.f32 %v2253_v24 }
 0x27f   :  { %v2287_v40 = vpop.eup %1807  ;;  %v972_v8 = vmul.f32 %v2279_v1, %v2232_v26  ;;  %v2337_v23 = vmax.f32 %v465_v27, 1e-24  ;;  %vm978_vm5 = vweird.f32 %v2279_v1 }
 0x280   :  { %v240_v38 = vrot.slane %v239_v22, 1  ;;  %v2294_v34 = vpop.eup %1809  ;;  %v2298_v7 = vsub.f32 %v360_v50, %v1746_v46  ;;  %v2319_v50 = vmax.f32 %v1046_v25, 1e-24  ;;  %v1380_v25 = vadd.f32 %v2212_v35, %v1993_v36  ;;  %vm2456_vm9 = vmor %vm977_vm3, %vm978_vm5 }
 0x281   :  { %v1476_v48 = vmul.f32 %v2294_v34, %v2236_v44  ;;  %v878_v36 = vsub.f32 %v876_v20, %v2283_v12  ;;  %v2350_v35 = vmax.f32 %v542_v55, 1e-24  ;;  %vm1223_vm6 = vweird.f32 %v2287_v40 }
 0x282   :  { %v241_v9 = vadd.f32 %v240_v38, %v239_v22  ;;  %v631_v22 = vadd.f32 %v2194_v14, %v1985_v28  ;;  %v1217_v14 = vmul.f32 %v2287_v40, %v2234_v11  ;;  %v2324_v38 = vpop.permute.xlu1 %403  ;;  %v2335_v33 = vpop.eup %1811  ;;  %v299_v28 = vmul.f32 0.5, %v298_v6  ;;  %vm2469_vm10 = vmor %vm1222_vm7, %vm1223_vm6 }
 0x283   :  { %1813 = vrsqrt.f32 %v2319_v50  ;;  %v804_v63 = vmul.f32 %v2335_v33, %v2253_v24  ;;  %v1382_v12 = vsub.f32 %v1380_v25, %v2292_v42  ;;  %v2365_v15 = vmax.f32 %v878_v36, 1e-24  ;;  %v2962_v25 = vld [vmem:[#allocation18_spill] sm:$0xff] }
 0x284   :  { %1684 = vpush %v241_v9  ;;  %v1550_v9 = vsub.f32 %v1548_v54, %v2251_v21  ;;  %v451_v21 = vsub.f32 %v2261_v3, %v2183_v2  ;;  %v973_v2 = vmul.f32 %v2279_v1, %v972_v8  ;;  %1815 = vrsqrt.f32 %v2329_v37 }
 0x285   :  { %1686 = vpush %v1835_v57  ;;  %v300_v46 = vsub.f32 1.5, %v299_v28  ;;  %1817 = vrsqrt.f32 %v2337_v23  ;;  %v805_v6 = vmul.f32 %v2335_v33, %v804_v63  ;;  %v2378_v27 = vmax.f32 %v1382_v12, 1e-24  ;;  %v1749_v12 = vld [vmem:[#allocation2 + $0x2] ss:$0 sm:$0xff] }
 0x286   :  { %1688 = vpush %v2044_v29  ;;  %v633_v29 = vsub.f32 %v631_v22, %v2259_v47  ;;  %v1218_v47 = vmul.f32 %v2287_v40, %v1217_v14  ;;  %v2344_v31 = vmax.f32 %v1550_v9, 1e-24  ;;  %v2391_v9 = vsub.f32 %v451_v21, %v1747_v58 }
 0x287   :  { %1690 = vpush %v2094_v19  ;;  %v710_v19 = vsub.f32 %v708_v59, %v2277_v53  ;;  %v806_v28 = vmul.f32 0.5, %v805_v6  ;;  %vm1482_vm8 = vweird.f32 %v2294_v34  ;;  %vm810_vm13 = vweird.f32 %v2335_v33 }
 0x288   :  { %1692 = vpush %v2109_v61  ;;  %v1477_v61 = vmul.f32 %v2294_v34, %v1476_v48  ;;  %v2357_v53 = vmax.f32 %v633_v29, 1e-24  ;;  %v1219_v39 = vmul.f32 0.5, %v1218_v47  ;;  %1819 = vrsqrt.f32 %v2344_v31  ;;  %v1838_v29 = vld [vmem:[#allocation4 + $0x7] sm:$0x1]  ;;  %vm2486_vm12 = vmor %vm1481_vm11, %vm1482_vm8 }
 0x289   :  { %1694 = vpush %v2117_v56  ;;  %v1137_v56 = vsub.f32 %v1135_v51, %v2285_v4  ;;  %v2362_v54 = vmax.f32 %v710_v19, 1e-24  ;;  %v1836_v4 = vld [vmem:[#allocation4 + $0x4] sm:$0x1]  ;;  %1821 = vrsqrt.f32 %v2350_v35  ;;  %v2380_v59 = vpop.eup %1813  ;;  %v528_v51 = vsub.f32 %v2265_v0, %v2188_v62  ;;  %v2963_v19 = vld [vmem:[#allocation17_spill] sm:$0xff]  ;;  %vm2530_vm15 = vmor %vm809_vm14, %vm810_vm13 }
 0x28a   :  { %1696 = vpush %v2128_v17  ;;  %v380_v17 = vsub.f32 1.5, %v379_v49  ;;  %v1478_v42 = vmul.f32 0.5, %v1477_v61  ;;  %1823 = vrsqrt.f32 %v2357_v53  ;;  %v2384_v57 = vpop.permute.xlu1 %1029  ;;  %v2389_v14 = vpop.eup %1815  ;;  %v1220_v48 = vsub.f32 1.5, %v1219_v39  ;;  %v2964_v47 = vld [vmem:[#allocation19_spill] sm:$0xff] }
 0x28b   :  { %1698 = vpush %v2107_v45  ;;  %v974_v45 = vmul.f32 0.5, %v973_v2  ;;  %v2372_v22 = vmax.f32 %v1137_v56, 1e-24  ;;  %1825 = vrsqrt.f32 %v2362_v54  ;;  %v2395_v55 = vpop.eup %1817  ;;  %v619_v49 = vsub.f32 %v2261_v3, %v2962_v25 }
 0x28c   :  { %1700 = vpush %v2141_v32  ;;  %v2370_v32 = vpop.permute.xlu0 %1120  ;;  %v381_v8 = vmul.f32 %v2241_v16, %v380_v17  ;;  %1827 = vrsqrt.f32 %v2365_v15  ;;  %v1479_v21 = vsub.f32 1.5, %v1478_v42  ;;  %v1049_v62 = vmul.f32 %v2380_v59, %v2319_v50 }
 0x28d   :  { %1702 = vpush %v1836_v4  ;;  %v975_v20 = vsub.f32 1.5, %v974_v45  ;;  %1829 = vrsqrt.f32 %v2372_v22  ;;  %v696_v36 = vsub.f32 %v2265_v0, %v2964_v47  ;;  %v468_v17 = vmul.f32 %v2395_v55, %v2337_v23 }
 0x28e   :  { %1704 = vpush %v2119_v5  ;;  %v1837_v5 = vld [vmem:[#allocation5 + $0x5] sm:$0x1]  ;;  %1831 = vrsqrt.f32 %v2378_v27  ;;  %v385_v56 = vsel %vm2401_vm2, %v2241_v16, %v381_v8  ;;  %v1221_v4 = vmul.f32 %v2287_v40, %v1220_v48  ;;  %v2445_v39 = vsub.f32 %v528_v51, %v1748_v30  ;;  %v1750_v16 = vld [vmem:[#allocation3 + $0x2] ss:$0 sm:$0xff] }
 0x28f   :  { %1706 = vpush %v2148_v43  ;;  %v301_v43 = vmul.f32 %v2248_v13, %v300_v46  ;;  %v976_v46 = vmul.f32 %v2279_v1, %v975_v20  ;;  %v2460_v6 = vsub.f32 %v619_v49, %v1749_v12  ;;  %v1050_v11 = vmul.f32 %v2380_v59, %v1049_v62  ;;  %v2969_v48 = vld [vmem:[#allocation20_spill] sm:$0xff]  ;;  %v1751_v62 = vld [vmem:[#allocation3 + $0x3] ss:$0 sm:$0xff] }
 0x290   :  { %1708 = vpush %v1837_v5  ;;  %v807_v5 = vsub.f32 1.5, %v806_v28  ;;  %v2474_v26 = vsub.f32 %v696_v36, %v1750_v16  ;;  %v1308_v44 = vmul.f32 %v2389_v14, %v2329_v37  ;;  %v469_v25 = vmul.f32 %v2395_v55, %v468_v17 }
 0x291   :  { %1710 = vpush %v2130_v18  ;;  %v305_v61 = vsel %vm2415_vm4, %v2248_v13, %v301_v43  ;;  %v1480_v13 = vmul.f32 %v2294_v34, %v1479_v21  ;;  %v2463_v43 = vperm.slane %v385_v56, 0  ;;  %v864_v18 = vsub.f32 %v2265_v0, %v2969_v48  ;;  %v2513_v56 = vpop.permute.xlu2 %952 }
 0x292   :  { %1712 = vpush %v2152_v60  ;;  %v2409_v60 = vpop.eup %1819  ;;  %v2480_v21 = vperm.slane %v305_v61, 0  ;;  %v980_v49 = vsel %vm2456_vm9, %v2279_v1, %v976_v46  ;;  %v1225_v28 = vsel %vm2469_vm10, %v2287_v40, %v1221_v4  ;;  %v2504_v47 = vpop.permute.xlu1 %830  ;;  %v1051_v1 = vmul.f32 0.5, %v1050_v11 }
 0x293   :  { %1714 = vpush %v1838_v29  ;;  %v2425_v2 = vpop.eup %1821  ;;  %v1484_v36 = vsel %vm2486_vm12, %v2294_v34, %v1480_v13  ;;  %v808_v12 = vmul.f32 %v2335_v33, %v807_v5  ;;  %v2516_v17 = vsub.f32 %v864_v18, %v1751_v62  ;;  %v1309_v16 = vmul.f32 %v2389_v14, %v1308_v44 }
 0x294   :  { %1716 = vpush %v2963_v19  ;;  %v2436_v63 = vpop.eup %1823  ;;  %v2478_v51 = vpop.permute.xlu0 %907  ;;  %v1553_v19 = vmul.f32 %v2409_v60, %v2344_v31  ;;  %v545_v30 = vmul.f32 %v2425_v2, %v2350_v35  ;;  %v470_v13 = vmul.f32 0.5, %v469_v25  ;;  %v2526_v58 = vperm.slane %v980_v49, 0 }
 0x295   :  { %v2443_v45 = vpop.eup %1825  ;;  %v636_v61 = vmul.f32 %v2436_v63, %v2357_v53  ;;  %v2536_v48 = vperm.slane %v1225_v28, 0  ;;  %v2538_v18 = vperm.slane %v1484_v36, 0  ;;  %v1052_v24 = vsub.f32 1.5, %v1051_v1 }
 0x296   :  { %v2450_v42 = vpop.eup %1827  ;;  %v713_v40 = vmul.f32 %v2443_v45, %v2362_v54  ;;  %v1554_v11 = vmul.f32 %v2409_v60, %v1553_v19  ;;  %v546_v20 = vmul.f32 %v2425_v2, %v545_v30  ;;  %v812_v25 = vsel %vm2530_vm15, %v2335_v33, %v808_v12 }
 0x297   :  { %v2465_v8 = vpop.eup %1829  ;;  %v881_v46 = vmul.f32 %v2450_v42, %v2365_v15  ;;  %v637_v41 = vmul.f32 %v2436_v63, %v636_v61  ;;  %vm1054_vm1 = vweird.f32 %v2319_v50  ;;  %vm1055_vm2 = vweird.f32 %v2380_v59 }
 0x298   :  { %v2482_v29 = vpop.eup %1831  ;;  %v1140_v4 = vmul.f32 %v2465_v8, %v2372_v22  ;;  %v714_v44 = vmul.f32 %v2443_v45, %v713_v40  ;;  %v1310_v19 = vmul.f32 0.5, %v1309_v16  ;;  %vm1313_vm3 = vweird.f32 %v2329_v37  ;;  %vm2570_vm9 = vmor %vm1054_vm1, %vm1055_vm2 }
 0x299   :  { %v1385_v34 = vmul.f32 %v2482_v29, %v2378_v27  ;;  %v882_v49 = vmul.f32 %v2450_v42, %v881_v46  ;;  %v471_v30 = vsub.f32 1.5, %v470_v13  ;;  %vm473_vm4 = vweird.f32 %v2337_v23 }
 0x29a   :  { %v1141_v62 = vmul.f32 %v2465_v8, %v1140_v4  ;;  %v1555_v36 = vmul.f32 0.5, %v1554_v11  ;;  %v547_v1 = vmul.f32 0.5, %v546_v20  ;;  %v2554_v33 = vperm.slane %v812_v25, 0  ;;  %v2559_v13 = vpop.permute.xlu1 %1365  ;;  %v2563_v11 = vpop.permute.xlu2 %1197 }
 0x29b   :  { %v1386_v28 = vmul.f32 %v2482_v29, %v1385_v34  ;;  %vm1314_vm5 = vweird.f32 %v2389_v14  ;;  %v638_v40 = vmul.f32 0.5, %v637_v41  ;;  %v715_v12 = vmul.f32 0.5, %v714_v44 }
 0x29c   :  { %v2552_v61 = vpop.permute.xlu0 %998  ;;  %v1053_v46 = vmul.f32 %v2380_v59, %v1052_v24  ;;  %vm474_vm6 = vweird.f32 %v2395_v55  ;;  %v883_v4 = vmul.f32 0.5, %v882_v49  ;;  %v1142_v34 = vmul.f32 0.5, %v1141_v62  ;;  %vm2581_vm11 = vmor %vm1313_vm3, %vm1314_vm5 }
 0x29d   :  { %v1387_v16 = vmul.f32 0.5, %v1386_v28  ;;  %v1311_v5 = vsub.f32 1.5, %v1310_v19  ;;  %vm1558_vm7 = vweird.f32 %v2344_v31  ;;  %vm550_vm8 = vweird.f32 %v2350_v35  ;;  %vm2593_vm13 = vmor %vm473_vm4, %vm474_vm6 }
 0x29e   :  { %v472_v20 = vmul.f32 %v2395_v55, %v471_v30  ;;  %v1556_v41 = vsub.f32 1.5, %v1555_v36  ;;  %vm1559_vm10 = vweird.f32 %v2409_v60  ;;  %v548_v44 = vsub.f32 1.5, %v547_v1  ;;  %v1754_v36 = vld [vmem:[#allocation2 + $0x3] ss:$0 sm:$0xff] }
 0x29f   :  { %v1123_v25 = vsub.f32 %v2261_v3, %v2370_v32  ;;  %vm551_vm12 = vweird.f32 %v2425_v2  ;;  %v639_v50 = vsub.f32 1.5, %v638_v40  ;;  %v716_v62 = vsub.f32 1.5, %v715_v12  ;;  %vm2600_vm15 = vmor %vm1558_vm7, %vm1559_vm10  ;;  %v1753_v32 = vld [vmem:[#allocation3 + $0x7] ss:$0 sm:$0xff] }
 0x2a0   :  { %v1057_v28 = vsel %vm2570_vm9, %v2380_v59, %v1053_v46  ;;  %vm642_vm14 = vweird.f32 %v2436_v63  ;;  %v884_v37 = vsub.f32 1.5, %v883_v4  ;;  %v1143_v19 = vsub.f32 1.5, %v1142_v34  ;;  %vm2612_vm3 = vmor %vm550_vm8, %vm551_vm12 }
 0x2a1   :  { %v1388_v30 = vsub.f32 1.5, %v1387_v16  ;;  %vm641_vm1 = vweird.f32 %v2357_v53  ;;  %vm719_vm2 = vweird.f32 %v2443_v45  ;;  %v476_v23 = vsel %vm2593_vm13, %v2395_v55, %v472_v20  ;;  %v1752_v55 = vld [vmem:[#allocation2 + $0x5] ss:$0 sm:$0xff] }
 0x2a2   :  { %v1312_v59 = vmul.f32 %v2389_v14, %v1311_v5  ;;  %vm718_vm4 = vweird.f32 %v2362_v54  ;;  %vm887_vm5 = vweird.f32 %v2450_v42  ;;  %v549_v31 = vmul.f32 %v2425_v2, %v548_v44  ;;  %vm2620_vm6 = vmor %vm641_vm1, %vm642_vm14  ;;  %v1457_v44 = vpop.permute.xlu1 %1456 }
 0x2a3   :  { %v1557_v53 = vmul.f32 %v2409_v60, %v1556_v41  ;;  %vm886_vm7 = vweird.f32 %v2365_v15  ;;  %vm1146_vm8 = vweird.f32 %v2465_v8  ;;  %v640_v35 = vmul.f32 %v2436_v63, %v639_v50  ;;  %vm2628_vm9 = vmor %vm718_vm4, %vm719_vm2 }
 0x2a4   :  { %v717_v12 = vmul.f32 %v2443_v45, %v716_v62  ;;  %v1534_v46 = vpop.permute.xlu0 %1533  ;;  %vm1391_vm10 = vweird.f32 %v2482_v29  ;;  %v885_v4 = vmul.f32 %v2450_v42, %v884_v37  ;;  %v1144_v34 = vmul.f32 %v2465_v8, %v1143_v19  ;;  %vm2640_vm12 = vmor %vm886_vm7, %vm887_vm5 }
 0x2a5   :  { %v1389_v16 = vmul.f32 %v2482_v29, %v1388_v30  ;;  %v2636_v15 = vsub.f32 %v1123_v25, %v1752_v55  ;;  %vm1145_vm13 = vweird.f32 %v2372_v22  ;;  %v2645_v20 = vperm.slane %v1057_v28, 0  ;;  %v1289_v28 = vpop.permute.xlu2 %1288 }
 0x2a6   :  { %v1316_v24 = vsel %vm2581_vm11, %v2389_v14, %v1312_v59  ;;  %vm2650_vm14 = vmor %vm1145_vm13, %vm1146_vm8  ;;  %vm1390_vm1 = vweird.f32 %v2378_v27  ;;  %v2655_v25 = vperm.slane %v476_v23, 0  ;;  %v553_v50 = vsel %vm2612_vm3, %v2425_v2, %v549_v31  ;;  %v2994_v27 = vld [vmem:[#allocation23_spill] sm:$0xff]  ;;  %v1755_v23 = vld [vmem:[#allocation3 + $0x4] ss:$0 sm:$0xff] }
 0x2a7   :  { %v1561_v22 = vsel %vm2600_vm15, %v2409_v60, %v1557_v53  ;;  %v1536_v49 = vsub.f32 %v2265_v0, %v1534_v46  ;;  %vm2666_vm11 = vmor %vm1390_vm1, %vm1391_vm10  ;;  %v787_v62 = vsub.f32 %v2261_v3, %v2994_v27  ;;  %v644_v2 = vsel %vm2620_vm6, %v2436_v63, %v640_v35  ;;  %v1756_v59 = vld [vmem:[#allocation3 + $0x6] ss:$0 sm:$0xff]  ;;  %v1757_v31 = vld [vmem:[#allocation2 + $0x7] ss:$0 sm:$0xff] }
 0x2a8   :  { %v721_v60 = vsel %vm2628_vm9, %v2443_v45, %v717_v12  ;;  %v1032_v37 = vsub.f32 %v2265_v0, %v2384_v57  ;;  %v889_v19 = vsel %vm2640_vm12, %v2450_v42, %v885_v4  ;;  %v1148_v30 = vsel %vm2650_vm14, %v2465_v8, %v1144_v34  ;;  %v1758_v35 = vld [vmem:[#allocation2 + $0x4] ss:$0 sm:$0xff]  ;;  %v1759_v12 = vld [vmem:[#allocation3 + $0x5] ss:$0 sm:$0xff] }
 0x2a9   :  { %v1393_v63 = vsel %vm2666_vm11, %v2482_v29, %v1389_v16  ;;  %v1368_v45 = vsub.f32 %v2265_v0, %v2559_v13  ;;  %v1459_v57 = vsub.f32 %v2261_v3, %v1457_v44  ;;  %v955_v1 = vsub.f32 %v2261_v3, %v2513_v56  ;;  %v2995_v44 = vld [vmem:[#allocation15_spill] sm:$0xff] }
 0x2aa   :  { %v1200_v42 = vsub.f32 %v2265_v0, %v2563_v11  ;;  %v1291_v8 = vsub.f32 %v2261_v3, %v1289_v28  ;;  %v2697_v53 = vperm.slane %v553_v50, 0  ;;  %v2699_v29 = vperm.slane %v1316_v24, 0  ;;  %v1760_v0 = vld [vmem:[#allocation2 + $0x6] ss:$0 sm:$0xff]  ;;  %v2996_v50 = vld [vmem:[#allocation16_spill] sm:$0xff] }
 0x2ab   :  { %v2701_v40 = vperm.slane %v1561_v22, 0  ;;  %v2703_v55 = vsub.f32 %v1536_v49, %v1753_v32  ;;  %v789_v13 = vsub.f32 %v787_v62, %v1754_v36  ;;  %v2705_v54 = vperm.slane %v644_v2, 0  ;;  %v2997_v2 = vld [vmem:[#allocation25_spill] sm:$0xff] }
 0x2ac   :  { %v2707_v56 = vperm.slane %v721_v60, 0  ;;  %v2709_v46 = vsub.f32 %v1032_v37, %v1755_v23  ;;  %v2713_v3 = vperm.slane %v889_v19, 0  ;;  %v2715_v11 = vperm.slane %v1148_v30, 0 }
 0x2ad   :  { %v2717_v4 = vperm.slane %v1393_v63, 0  ;;  %v2719_v34 = vsub.f32 %v1368_v45, %v1756_v59  ;;  %v2721_v16 = vsub.f32 %v1459_v57, %v1757_v31  ;;  %v2723_v5 = vsub.f32 %v955_v1, %v1758_v35  ;;  %v2737_v28 = vpop.permute.xlu2 %1075  ;;  %v3000_v63 = vld [vmem:[#allocation24_spill] sm:$0xff] }
 0x2ae   :  { %v2725_v24 = vsub.f32 %v1200_v42, %v1759_v12  ;;  %v2727_v41 = vsub.f32 %v1291_v8, %v1760_v0  ;;  %vm247_vm15 = vcmp.ne.s32.totalorder %v2995_v44, 0  ;;  %vm248_vm2 = vcmp.ne.s32.totalorder %v2996_v50, 0 }
 0x2af   :  { %vm421_vm3 = vcmp.ne.s32.totalorder %v2995_v44, 1  ;;  %vm422_vm4 = vcmp.ne.s32.totalorder %v2996_v50, 1  ;;  %vm589_vm5 = vcmp.ne.s32.totalorder %v2995_v44, 2  ;;  %vm590_vm6 = vcmp.ne.s32.totalorder %v2996_v50, 2  ;;  %vm2746_vm8 = vmand %vm247_vm15, %vm248_vm2 }
 0x2b0   :  { %vm757_vm7 = vcmp.ne.s32.totalorder %v2995_v44, 3  ;;  %vm758_vm9 = vcmp.ne.s32.totalorder %v2996_v50, 3  ;;  %vm925_vm10 = vcmp.ne.s32.totalorder %v2995_v44, 4  ;;  %vm2762_vm12 = vmand %vm421_vm3, %vm422_vm4  ;;  %vm926_vm1 = vcmp.ne.s32.totalorder %v2996_v50, 4 }
 0x2b1   :  { %vm2779_vm13 = vmand %vm589_vm5, %vm590_vm6  ;;  %vm1093_vm11 = vcmp.ne.s32.totalorder %v2995_v44, 5  ;;  %vm1094_vm15 = vcmp.ne.s32.totalorder %v2996_v50, 5  ;;  %vm1261_vm3 = vcmp.ne.s32.totalorder %v2995_v44, 6  ;;  %vm1262_vm4 = vcmp.ne.s32.totalorder %v2996_v50, 6 }
 0x2b2   :  { %vm2802_vm14 = vmand %vm757_vm7, %vm758_vm9  ;;  %vm1429_vm5 = vcmp.ne.s32.totalorder %v2995_v44, 7  ;;  %vm1430_vm6 = vcmp.ne.s32.totalorder %v2996_v50, 7 }
 0x2b5   :  { %s2711_s23 = spop %1684 }
 0x2b6   :  { %s1687_s24 = spop %1686  ;;  %s243_s12 = smul.f32 0.015625, %s2711_s23 }
 0x2b7   :  { %v285_v22 = vstv %s1687_s24  ;;  %s1689_s25 = spop %1688 }
 0x2b8   :  { %v287_v49 = vadd.f32 %v285_v22, %v2296_v52  ;;  %v365_v14 = vstv %s1689_s25  ;;  %s1691_s26 = spop %1690  ;;  %s1606_s15 = smul.f32 0.5, %s243_s12 }
 0x2b9   :  { %v367_v27 = vadd.f32 %v365_v14, %v2298_v7  ;;  %v456_v62 = vstv %s1691_s26  ;;  %s1693_s27 = spop %1692 }
 0x2ba   :  { %v326_v60 = vmul.f32 %v2997_v2, %v287_v49  ;;  %v458_v52 = vadd.f32 %v456_v62, %v2391_v9  ;;  %v533_v32 = vstv %s1693_s27  ;;  %s1695_s28 = spop %1694 }
 0x2bb   :  { %v406_v37 = vmul.f32 %v2324_v38, %v367_v27  ;;  %v535_v19 = vadd.f32 %v533_v32, %v2445_v39  ;;  %v624_v30 = vstv %s1695_s28  ;;  %s1697_s29 = spop %1696  ;;  %v1335_v38 = vpop.permute.xlu0 %1334 }
 0x2bc   :  { %v328_v9 = vmul.f32 %v2480_v21, %v326_v60  ;;  %v497_v36 = vmul.f32 %v3000_v63, %v458_v52  ;;  %v626_v23 = vadd.f32 %v624_v30, %v2460_v6  ;;  %v701_v59 = vstv %s1697_s29  ;;  %s1699_s30 = spop %1698  ;;  %v1244_v30 = vpop.permute.xlu1 %1243 }
 0x2bd   :  { %v408_v45 = vmul.f32 %v2463_v43, %v406_v37  ;;  %v574_v39 = vmul.f32 %v2305_v10, %v535_v19  ;;  %v703_v21 = vadd.f32 %v701_v59, %v2474_v26  ;;  %v792_v57 = vstv %s1699_s30  ;;  %s1701_s3 = spop %1700  ;;  %v3003_v43 = vld [vmem:[#allocation21_spill] sm:$0xff]  ;;  %v3006_v26 = vld [vmem:[#allocation22_spill] sm:$0xff]  ;;  %v1167_v37 = vpop.permute.xlu2 %1166 }
 0x2be   :  { %v329_v6 = vsel %vm2746_vm8, %v328_v9, 0.0  ;;  %v499_v1 = vmul.f32 %v2655_v25, %v497_v36  ;;  %v665_v42 = vmul.f32 %v3003_v43, %v626_v23  ;;  %v794_v31 = vadd.f32 %v792_v57, %v789_v13  ;;  %s1703_s4 = spop %1702 }
 0x2bf   :  { %v409_v8 = vsel %vm2746_vm8, %v408_v45, 0.0  ;;  %v576_v35 = vmul.f32 %v2697_v53, %v574_v39  ;;  %v742_v12 = vmul.f32 %v3006_v26, %v703_v21  ;;  %v869_v25 = vstv %s1701_s3  ;;  %s2784_s5 = spop %1704  ;;  %vm2847_vm8 = vmand %vm925_vm10, %vm926_vm1 }
 0x2c0   :  { %v410_v13 = vsub.f32 %v409_v8, %v329_v6  ;;  %v500_v0 = vsel %vm2762_vm12, %v499_v1, 0.0  ;;  %v667_v22 = vmul.f32 %v2705_v54, %v665_v42  ;;  %v833_v53 = vmul.f32 %v2504_v47, %v794_v31  ;;  %s2794_s6 = spop %1706  ;;  %vm2874_vm10 = vmand %vm1093_vm11, %vm1094_vm15 }
 0x2c1   :  { %v577_v49 = vsel %vm2762_vm12, %v576_v35, 0.0  ;;  %v744_v14 = vmul.f32 %v2707_v56, %v742_v12  ;;  %v871_v27 = vadd.f32 %v869_v25, %v2516_v17  ;;  %v960_v62 = vstv %s1703_s4  ;;  %s2811_s7 = spop %1708  ;;  %vm2892_vm12 = vmand %vm1261_vm3, %vm1262_vm4 }
 0x2c2   :  { %v411_v2 = vand.u32 2147483647, %v410_v13  ;;  %v413_v60 = vmul.f32 0.5, %v410_v13  ;;  %v578_v52 = vsub.f32 %v577_v49, %v500_v0  ;;  %v668_v32 = vsel %vm2779_vm13, %v667_v22, 0.0  ;;  %s2825_s8 = spop %1710 }
 0x2c3   :  { %v745_v17 = vsel %vm2779_vm13, %v744_v14, 0.0  ;;  %v835_v54 = vmul.f32 %v2554_v33, %v833_v53  ;;  %v910_v56 = vmul.f32 %v2478_v51, %v871_v27  ;;  %v962_v7 = vadd.f32 %v960_v62, %v2723_v5  ;;  %s1713_s9 = spop %1712  ;;  %vm2907_vm13 = vmand %vm1429_vm5, %vm1430_vm6 }
 0x2c4   :  { %v579_v19 = vand.u32 2147483647, %v578_v52  ;;  %vm2816_vm2 = vcmp.lt.f32.partialorder %v411_v2, 1.0  ;;  %v581_v33 = vmul.f32 0.5, %v578_v52  ;;  %v746_v51 = vsub.f32 %v745_v17, %v668_v32  ;;  %s1715_s10 = spop %1714 }
 0x2c5   :  { %v836_v5 = vsel %vm2802_vm14, %v835_v54, 0.0  ;;  %v912_v63 = vmul.f32 %v2713_v3, %v910_v56  ;;  %v2827_v36 = vmul.f32 %v413_v60, %v410_v13  ;;  %v2829_v23 = vadd.f32 -0.5, %v411_v2  ;;  %s1717_s11 = spop %1716  ;;  %v1412_v47 = vpop.permute.xlu2 %1411 }
 0x2c6   :  { %v1001_v59 = vmul.f32 %v2552_v61, %v962_v7  ;;  %v1037_v45 = vstv %s2784_s5  ;;  %vm2835_vm7 = vcmp.lt.f32.partialorder %v579_v19, 1.0  ;;  %v2839_v39 = vadd.f32 -0.5, %v579_v19  ;;  %v1503_v7 = vpop.permute.xlu1 %1502 }
 0x2c7   :  { %v747_v21 = vand.u32 2147483647, %v746_v51  ;;  %v749_v57 = vmul.f32 0.5, %v746_v51  ;;  %v913_v6 = vsel %vm2802_vm14, %v912_v63, 0.0  ;;  %v1039_v42 = vadd.f32 %v1037_v45, %v2709_v46 }
 0x2c8   :  { %v2851_v1 = vsub.f32 %v913_v6, %v836_v5  ;;  %v1003_v43 = vmul.f32 %v2526_v58, %v1001_v59  ;;  %v1128_v31 = vstv %s2794_s6  ;;  %v582_v8 = vmul.f32 %v581_v33, %v578_v52 }
 0x2c9   :  { %v750_v35 = vmul.f32 %v749_v57, %v746_v51  ;;  %v1649_v10 = vadd.f32 -0.5, %v747_v21  ;;  %v1130_v26 = vadd.f32 %v1128_v31, %v2636_v15  ;;  %vm2857_vm9 = vcmp.lt.f32.partialorder %v747_v21, 1.0  ;;  %v1580_v51 = vpop.permute.xlu0 %1579 }
 0x2ca   :  { %v915_v25 = vand.u32 2147483647, %v2851_v1  ;;  %v917_v13 = vmul.f32 0.5, %v2851_v1  ;;  %v1004_v58 = vsel %vm2847_vm8, %v1003_v43, 0.0  ;;  %v1078_v46 = vmul.f32 %v2737_v28, %v1039_v42 }
 0x2cb   :  { %v1169_v0 = vmul.f32 %v1167_v37, %v1130_v26  ;;  %v1205_v22 = vstv %s2811_s7  ;;  %v1296_v53 = vstv %s2825_s8  ;;  %v1373_v49 = vstv %s1713_s9 }
 0x2cc   :  { %v918_v15 = vmul.f32 %v917_v13, %v2851_v1  ;;  %v1655_v14 = vadd.f32 -0.5, %v915_v25  ;;  %v1080_v27 = vmul.f32 %v2645_v20, %v1078_v46  ;;  %v1207_v28 = vadd.f32 %v1205_v22, %v2725_v24 }
 0x2cd   :  { %v1171_v2 = vmul.f32 %v2715_v11, %v1169_v0  ;;  %v1298_v60 = vadd.f32 %v1296_v53, %v2727_v41  ;;  %v1375_v52 = vadd.f32 %v1373_v49, %v2719_v34  ;;  %v1464_v32 = vstv %s1715_s10 }
 0x2ce   :  { %v1081_v20 = vsel %vm2847_vm8, %v1080_v27, 0.0  ;;  %v1246_v17 = vmul.f32 %v1244_v30, %v1207_v28  ;;  %v1466_v54 = vadd.f32 %v1464_v32, %v2721_v16  ;;  %v1541_v56 = vstv %s1717_s11 }
 0x2cf   :  { %v1082_v37 = vsub.f32 %v1081_v20, %v1004_v58  ;;  %v1172_v24 = vsel %vm2874_vm10, %v1171_v2, 0.0  ;;  %v1337_v19 = vmul.f32 %v1335_v38, %v1298_v60  ;;  %v1414_v11 = vmul.f32 %v1412_v47, %v1375_v52 }
 0x2d0   :  { %v1248_v41 = vmul.f32 %v2536_v48, %v1246_v17  ;;  %v1505_v30 = vmul.f32 %v1503_v7, %v1466_v54  ;;  %v1543_v16 = vadd.f32 %v1541_v56, %v2703_v55  ;;  %v416_v33 = vsel %vm2816_vm2, %v2827_v36, %v2829_v23 }
 0x2d1   :  { %v1083_v5 = vand.u32 2147483647, %v1082_v37  ;;  %v1085_v63 = vmul.f32 0.5, %v1082_v37  ;;  %v1339_v48 = vmul.f32 %v2699_v29, %v1337_v19  ;;  %v1416_v59 = vmul.f32 %v2717_v4, %v1414_v11 }
 0x2d2   :  { %v1249_v55 = vsel %vm2874_vm10, %v1248_v41, 0.0  ;;  %v1507_v9 = vmul.f32 %v2538_v18, %v1505_v30  ;;  %v1582_v36 = vmul.f32 %v1580_v51, %v1543_v16  ;;  %v584_v29 = vsel %vm2835_vm7, %v582_v8, %v2839_v39 }
 0x2d3   :  { %v1086_v23 = vmul.f32 %v1085_v63, %v1082_v37  ;;  %v1250_v4 = vsub.f32 %v1249_v55, %v1172_v24  ;;  %v1340_v50 = vsel %vm2892_vm12, %v1339_v48, 0.0  ;;  %v1417_v44 = vsel %vm2892_vm12, %v1416_v59, 0.0 }
 0x2d4   :  { %v1418_v38 = vsub.f32 %v1417_v44, %v1340_v50  ;;  %v1508_v21 = vsel %vm2907_vm13, %v1507_v9, 0.0  ;;  %v1584_v57 = vmul.f32 %v2701_v40, %v1582_v36  ;;  %v585_v18 = vadd.f32 %v584_v29, %v416_v33 }
 0x2d5   :  { %v1253_v6 = vmul.f32 0.5, %v1250_v4  ;;  %v752_v3 = vsel %vm2857_vm9, %v750_v35, %v1649_v10  ;;  %vm916_vm14 = vcmp.lt.f32.partialorder %v915_v25, 1.0  ;;  %vm2926_vm1 = vcmp.lt.f32.partialorder %v1083_v5, 1.0 }
 0x2d6   :  { %v1585_v61 = vsel %vm2907_vm13, %v1584_v57, 0.0  ;;  %v753_v1 = vadd.f32 %v752_v3, %v585_v18  ;;  %v920_v43 = vsel %vm916_vm14, %v918_v15, %v1655_v14  ;;  %v1661_v42 = vadd.f32 -0.5, %v1083_v5 }
 0x2d7   :  { %v1586_v31 = vsub.f32 %v1585_v61, %v1508_v21  ;;  %v1251_v8 = vand.u32 2147483647, %v1250_v4  ;;  %v1254_v26 = vmul.f32 %v1253_v6, %v1250_v4  ;;  %v1419_v40 = vand.u32 2147483647, %v1418_v38 }
 0x2d8   :  { %v921_v13 = vadd.f32 %v920_v43, %v753_v1  ;;  %v1088_v12 = vsel %vm2926_vm1, %v1086_v23, %v1661_v42  ;;  %v1421_v35 = vmul.f32 0.5, %v1418_v38 }
 0x2d9   :  { %vm1252_vm11 = vcmp.lt.f32.partialorder %v1251_v8, 1.0  ;;  %v1667_v10 = vadd.f32 -0.5, %v1251_v8  ;;  %vm1420_vm15 = vcmp.lt.f32.partialorder %v1419_v40, 1.0  ;;  %v1673_v25 = vadd.f32 -0.5, %v1419_v40 }
 0x2da   :  { %v1089_v58 = vadd.f32 %v1088_v12, %v921_v13  ;;  %v1422_v46 = vmul.f32 %v1421_v35, %v1418_v38  ;;  %v1587_v0 = vand.u32 2147483647, %v1586_v31  ;;  %v1589_v22 = vmul.f32 0.5, %v1586_v31 }
 0x2db   :  { %v1256_v53 = vsel %vm1252_vm11, %v1254_v26, %v1667_v10 }
 0x2dc   :  { %v1257_v49 = vadd.f32 %v1256_v53, %v1089_v58  ;;  %vm1588_vm2 = vcmp.lt.f32.partialorder %v1587_v0, 1.0  ;;  %v1590_v15 = vmul.f32 %v1589_v22, %v1586_v31  ;;  %v1424_v14 = vsel %vm1420_vm15, %v1422_v46, %v1673_v25 }
 0x2dd   :  { %v1679_v27 = vadd.f32 -0.5, %v1587_v0 }
 0x2de   :  { %v1425_v62 = vadd.f32 %v1424_v14, %v1257_v49 }
 0x2df   :  { %v1592_v28 = vsel %vm1588_vm2, %v1590_v15, %v1679_v27 }
 0x2e0   :  { %v1593_v2 = vadd.f32 %v1592_v28, %v1425_v62 }
 0x2e2   :  { %v1594_v60 = vsel %vm44_vm0, %v1593_v2, 0.0 }
 0x2e3   :  { %1595 = vadd.xlane.f32.xlu2 %v1594_v60 }
 0x356   :  { %v1596_v52 = vpop.xlane.xlu2 %1595 }
 0x357   :  { %v1597_v32 = vrot.slane %v1596_v52, 4 }
 0x359   :  { %v1598_v47 = vadd.f32 %v1597_v32, %v1596_v52 }
 0x35b   :  { %v1599_v20 = vrot.slane %v1598_v47, 2 }
 0x35d   :  { %v1600_v17 = vadd.f32 %v1599_v20, %v1598_v47 }
 0x35f   :  { %v1601_v54 = vrot.slane %v1600_v17, 1 }
 0x361   :  { %v1602_v56 = vadd.f32 %v1601_v54, %v1600_v17 }
 0x363   :  { %1718 = vpush %v1602_v56 }
 0x394   :  { %s1719_s13 = spop %1718 }
 0x395   :  { %s1604_s14 = smul.f32 0.001953125, %s1719_s13 }
 0x397   :  { %s1605_s0 = smul.f32 0.5, %s1604_s14 }
 0x399   :  { %s1607_s1 = sadd.f32 %s1606_s15, %s1605_s0 }
 0x39b   :  { %1609 = sst [smem:[#allocation11]] %s1607_s1 }
 0x39c   :  { %1618 = dma.smem_to_hbm %s1910_s19, 16, %s1616_s18, [#allocation8]  }
 0x39d   :  { %1903 = dma.done.wait [#allocation8], 16  }
 0x39e   :  { %1904 = vsyncadd [#allocation8], 4294967280 }
 0x39f   :  { %1623 = sfence }
 0x3a0   :  { %1624 = vsyncpa [#allocation7], 1 }
 0x3a1   :  { %1625 = vsyncpa [#allocation10], 1 }
 0x3a2   :  { %1626 = vsyncpa [#allocation8], 1 }

</bundles_post_ra>
